<compile_context>
chip_gen: v6e
topology: v6e:2x2x1
jax: 0.10.0
libtpu: 0.0.40
codegen_flags: <defaults>
</compile_context>

<pallas_src>
import functools

import jax
import jax.numpy as jnp
from jax.experimental import pallas as pl
from jax.experimental.pallas import tpu as pltpu


# ------------------------------ fused kernel ------------------------------- #

def encoder_kernel(graph_ref, wf_ref, wg_ref, xall_ref, wih_ref, whh_ref, b_ref,
                   slab_ref, hc_ref, gx_ref, *, seq_len, hidden, n_time,
                   n_station, n_feat):
    SEQ, H, T, N, F = seq_len, hidden, n_time, n_station, n_feat
    B = T * N
    PAD = (SEQ - 1) * N

    # ---- GCN: A = (sum_k graph[k] * softmax(weight_fusion)[k]) @ weight_gcn
    wf = wf_ref[...]                                        # (3, N, N)
    wf_max = jnp.max(wf, axis=0, keepdims=True)
    e = jnp.exp(wf - wf_max)
    sm = e / jnp.sum(e, axis=0, keepdims=True)              # softmax over 3 slots
    fusion = jnp.sum(graph_ref[...] * sm, axis=0)           # (N, N)
    A = jnp.dot(fusion, wg_ref[...], preferred_element_type=jnp.float32)

    # ---- one batched MXU matmul for all T time steps + one relu.
    #      xall_ref holds x transposed to (N, T*F): xall[n, t*F + f] = x[t, n, f].
    y = jnp.maximum(
        jnp.dot(A, xall_ref[...], preferred_element_type=jnp.float32), 0.0)

    # ---- padded slab output (rows ordered (padded_time, station)):
    #      zero the left pad once, scatter the T time blocks at 8-aligned offsets.
    if PAD > 0:
        slab_ref[0:PAD, :] = jnp.zeros((PAD, F), jnp.float32)
    for t in range(T):                                      # static; T is small
        slab_ref[PAD + t * N:PAD + (t + 1) * N, :] = y[:, t * F:(t + 1) * F]

    # ---- hoisted merged-gate LSTM input projection for ALL padded steps
    #      (K=F=2 -> VPU broadcast FMAs; one (P*N, 4H) tile).  Padded rows are
    #      zero, so their projection is just the bias (matches reference).
    slab = slab_ref[...]                                    # (P*N, F)
    wih = wih_ref[...]                                      # (F, 4H) = W_ih^T
    gx_ref[...] = (slab[:, 0:1] * wih[0:1, :]
                   + slab[:, 1:2] * wih[1:2, :]
                   + b_ref[...])                            # (P*N, 4H)

    # ---- recurrence: ONE (B,H)@(H,4H) MXU matmul per step; activations fused
    #      into two passes (sigmoid / tanh) selected by a hoisted lane mask.
    whh = whh_ref[...]                                      # (H, 4H) = W_hh^T
    lane = jax.lax.broadcasted_iota(jnp.int32, (B, 4 * H), 1)
    is_g = (lane >= 2 * H) & (lane < 3 * H)                 # tanh lanes (gate g)
    h = jnp.zeros((B, H), jnp.float32)
    c = jnp.zeros((B, H), jnp.float32)
    for s in range(SEQ):   # SEQ small -> static unroll (lax.fori_loop if it grows)
        r0 = s * N                                          # static, 8-aligned
        gates = gx_ref[r0:r0 + B, :] + jnp.dot(
            h, whh, preferred_element_type=jnp.float32)     # (B, 4H)
        act = jnp.where(is_g, jnp.tanh(gates), jax.nn.sigmoid(gates))
        i_g = act[:, 0 * H:1 * H]
        f_g = act[:, 1 * H:2 * H]
        g_g = act[:, 2 * H:3 * H]
        o_g = act[:, 3 * H:4 * H]
        c = f_g * c + i_g * g_g
        h = o_g * jnp.tanh(c)

    hc_ref[0, :, :] = h
    hc_ref[1, :, :] = c


# -------------------------------- wrapper ----------------------------------- #

def encoder_forward(x, graph, params, *, seq_len, hidden):
    """x: (T, N, F=2), graph: (3, N, N). Returns (windows, (h, c)) like the
       PyTorch Encoder: windows (seq_len, T*N, F), h/c (1, T*N, hidden)."""
    T, N, F = x.shape
    H = hidden
    B = T * N
    P = T + seq_len - 1

    # One-time prep (plain XLA): batch the GCN input on the lane axis and lay the
    # LSTM weights out so the kernel does a single merged-gate matmul per step.
    x_all = jnp.transpose(x, (1, 0, 2)).reshape(N, T * F)        # (N, T*F)
    wih_t = params["w_ih"].T                                     # (F, 4H), gates i|f|g|o
    whh_t = params["w_hh"].T                                     # (H, 4H)
    bias = (params["b_ih"] + params["b_hh"]).reshape(1, 4 * H)   # (1, 4H)

    vmem = pl.BlockSpec(memory_space=pltpu.MemorySpace.VMEM)
    slab, hc = pl.pallas_call(
        functools.partial(encoder_kernel, seq_len=seq_len, hidden=H,
                          n_time=T, n_station=N, n_feat=F),
        out_shape=(jax.ShapeDtypeStruct((P * N, F), jnp.float32),   # padded slab (unique data)
                   jax.ShapeDtypeStruct((2, B, H), jnp.float32)),   # packed (h, c)
        in_specs=[vmem] * 7,
        out_specs=(vmem, vmem),
        scratch_shapes=[pltpu.VMEM((P * N, 4 * H), jnp.float32)],   # hoisted gate inputs
    )(graph, params["weight_fusion"], params["weight_gcn"], x_all,
      wih_t, whh_t, bias)

    # Rebuild the SEQ-times-redundant overlapping-window view outside the kernel:
    # windows[s] is the contiguous slab slice [s*N : s*N + T*N].
    windows = jnp.stack([slab[s * N:s * N + B] for s in range(seq_len)], axis=0)
    return windows, (hc[0][None], hc[1][None])                   # h, c: (1, B, H)


# --------------------------- pure-JAX reference ----------------------------- #

def encoder_ref(x, graph, params, *, seq_len, hidden):
    sm = jax.nn.softmax(params["weight_fusion"], axis=0)
    fusion = jnp.sum(graph * sm, axis=0)
    A = fusion @ params["weight_gcn"]
    y = jnp.maximum(jnp.einsum("ij,tjf->tif", A, x), 0.0)
    T, N, F = x.shape
    xp = jnp.concatenate([jnp.zeros((seq_len - 1, N, F), y.dtype), y], axis=0)
    wins = jnp.concatenate([xp[j:j + seq_len] for j in range(T)], axis=1)
    B, H = T * N, hidden
    h = jnp.zeros((B, H)); c = jnp.zeros((B, H))
    for t in range(seq_len):
        gates = (wins[t] @ params["w_ih"].T + params["b_ih"]
                 + h @ params["w_hh"].T + params["b_hh"])
        i = jax.nn.sigmoid(gates[:, :H]); f = jax.nn.sigmoid(gates[:, H:2 * H])
        g = jnp.tanh(gates[:, 2 * H:3 * H]); o = jax.nn.sigmoid(gates[:, 3 * H:])
        c = f * c + i * g
        h = o * jnp.tanh(c)
    return wins, (h[None], c[None])


# --------------------------------- main ------------------------------------ #

def glorot_uniform(key, shape):
    fan_in, fan_out = shape[-1], shape[-2]
    limit = (6.0 / (fan_in + fan_out)) ** 0.5
    return jax.random.uniform(key, shape, jnp.float32, -limit, limit)


if __name__ == "__main__":
    # small shapes consistent with the module
    T, N, F = 6, 8, 2          # time steps, station_num, in_channels
    SEQ_LEN, HIDDEN = 4, 16

    key = jax.random.PRNGKey(0)
    k = jax.random.split(key, 8)

    params = {
        "weight_fusion": glorot_uniform(k[0], (3, N, N)),
        "weight_gcn":    glorot_uniform(k[1], (N, N)),
        "w_ih": jax.random.uniform(k[2], (4 * HIDDEN, F), jnp.float32, -0.25, 0.25),
        "w_hh": jax.random.uniform(k[3], (4 * HIDDEN, HIDDEN), jnp.float32, -0.25, 0.25),
        "b_ih": jax.random.uniform(k[4], (4 * HIDDEN,), jnp.float32, -0.25, 0.25),
        "b_hh": jax.random.uniform(k[5], (4 * HIDDEN,), jnp.float32, -0.25, 0.25),
    }

    x = jax.random.normal(k[6], (T, N, F), jnp.float32)
    graph = jax.random.uniform(k[7], (3, N, N), jnp.float32)

    wins, (h, c) = encoder_forward(x, graph, params, seq_len=SEQ_LEN, hidden=HIDDEN)
    jax.block_until_ready((wins, h, c))

    wins_r, (h_r, c_r) = encoder_ref(x, graph, params, seq_len=SEQ_LEN, hidden=HIDDEN)
    assert wins.shape == (SEQ_LEN, T * N, F)
    assert h.shape == (1, T * N, HIDDEN) and c.shape == (1, T * N, HIDDEN)
    assert jnp.allclose(wins, wins_r, rtol=1e-3, atol=1e-3)
    assert jnp.allclose(h, h_r, rtol=1e-3, atol=1e-3)
    assert jnp.allclose(c, c_r, rtol=1e-3, atol=1e-3)

    print("KERNEL_OK")
</pallas_src>

<mosaic_0001>
module attributes {stable_mosaic.version = 11 : i64} {
  func.func @encoder_kernel(%arg0: memref<3x8x8xf32, #tpu.memory_space<vmem>>, %arg1: memref<3x8x8xf32, #tpu.memory_space<vmem>>, %arg2: memref<8x8xf32, #tpu.memory_space<vmem>>, %arg3: memref<8x12xf32, #tpu.memory_space<vmem>>, %arg4: memref<2x64xf32, #tpu.memory_space<vmem>>, %arg5: memref<16x64xf32, #tpu.memory_space<vmem>>, %arg6: memref<1x64xf32, #tpu.memory_space<vmem>>, %arg7: memref<72x2xf32, #tpu.memory_space<vmem>>, %arg8: memref<2x48x16xf32, #tpu.memory_space<vmem>>, %arg9: memref<72x64xf32, #tpu.memory_space<vmem>>) attributes {dimension_semantics = [], scalar_prefetch = 0 : i64, scratch_operands = 1 : i64, tpu.core_type = #tpu.core_type<tc>} {
    %c0 = arith.constant 0 : index
    %c0_0 = arith.constant 0 : index
    %c0_1 = arith.constant 0 : index
    %0 = vector.load %arg1[%c0, %c0_0, %c0_1] : memref<3x8x8xf32, #tpu.memory_space<vmem>>, vector<3x8x8xf32>
    %cst = arith.constant dense<0xFF800000> : vector<8x8xf32>
    %1 = vector.multi_reduction <maximumf>, %0, %cst [0] : vector<3x8x8xf32> to vector<8x8xf32>
    %2 = vector.shape_cast %1 : vector<8x8xf32> to vector<1x8x8xf32>
    %3 = vector.broadcast %2 : vector<1x8x8xf32> to vector<3x8x8xf32>
    %4 = arith.subf %0, %3 : vector<3x8x8xf32>
    %5 = math.exp %4 : vector<3x8x8xf32>
    %cst_2 = arith.constant dense<0.000000e+00> : vector<8x8xf32>
    %6 = vector.multi_reduction <add>, %5, %cst_2 [0] : vector<3x8x8xf32> to vector<8x8xf32>
    %7 = vector.shape_cast %6 : vector<8x8xf32> to vector<1x8x8xf32>
    %8 = vector.broadcast %7 : vector<1x8x8xf32> to vector<3x8x8xf32>
    %9 = arith.divf %5, %8 : vector<3x8x8xf32>
    %c0_3 = arith.constant 0 : index
    %c0_4 = arith.constant 0 : index
    %c0_5 = arith.constant 0 : index
    %10 = vector.load %arg0[%c0_3, %c0_4, %c0_5] : memref<3x8x8xf32, #tpu.memory_space<vmem>>, vector<3x8x8xf32>
    %11 = arith.mulf %10, %9 : vector<3x8x8xf32>
    %cst_6 = arith.constant dense<0.000000e+00> : vector<8x8xf32>
    %12 = vector.multi_reduction <add>, %11, %cst_6 [0] : vector<3x8x8xf32> to vector<8x8xf32>
    %c0_7 = arith.constant 0 : index
    %c0_8 = arith.constant 0 : index
    %13 = vector.load %arg2[%c0_7, %c0_8] : memref<8x8xf32, #tpu.memory_space<vmem>>, vector<8x8xf32>
    %cst_9 = arith.constant dense<0.000000e+00> : vector<8x8xf32>
    %14 = tpu.matmul %12, %13, %cst_9 {dimension_numbers = #tpu.dot_dimension_numbers<[1], [0], [0], [1], [0, 0, 1, 1], [], []>} : vector<8x8xf32>, vector<8x8xf32>, vector<8x8xf32> -> vector<8x8xf32>
    %c0_10 = arith.constant 0 : index
    %c0_11 = arith.constant 0 : index
    %15 = vector.load %arg3[%c0_10, %c0_11] : memref<8x12xf32, #tpu.memory_space<vmem>>, vector<8x12xf32>
    %cst_12 = arith.constant dense<0.000000e+00> : vector<8x12xf32>
    %16 = tpu.matmul %14, %15, %cst_12 {dimension_numbers = #tpu.dot_dimension_numbers<[1], [0], [0], [1], [0, 0, 1, 1], [], []>} : vector<8x8xf32>, vector<8x12xf32>, vector<8x12xf32> -> vector<8x12xf32>
    %cst_13 = arith.constant 0.000000e+00 : f32
    %17 = vector.broadcast %cst_13 : f32 to vector<8x12xf32>
    %18 = arith.maximumf %16, %17 : vector<8x12xf32>
    %cst_14 = arith.constant 0.000000e+00 : f32
    %19 = vector.broadcast %cst_14 : f32 to vector<24x2xf32>
    %c0_15 = arith.constant 0 : index
    %c0_16 = arith.constant 0 : index
    %20 = vector.load %arg7[%c0_15, %c0_16] : memref<72x2xf32, #tpu.memory_space<vmem>>, vector<24x2xf32>
    tpu.vector_store %arg7[%c0_15, %c0_16], %19 {strides = array<i32>} : memref<72x2xf32, #tpu.memory_space<vmem>>, vector<24x2xf32>,
    %21 = vector.extract_strided_slice %18 {offsets = [0, 0], sizes = [8, 2], strides = [1, 1]} : vector<8x12xf32> to vector<8x2xf32>
    %c24 = arith.constant 24 : index
    %c0_17 = arith.constant 0 : index
    %22 = vector.load %arg7[%c24, %c0_17] : memref<72x2xf32, #tpu.memory_space<vmem>>, vector<8x2xf32>
    tpu.vector_store %arg7[%c24, %c0_17], %21 {strides = array<i32>} : memref<72x2xf32, #tpu.memory_space<vmem>>, vector<8x2xf32>,
    %23 = vector.extract_strided_slice %18 {offsets = [0, 2], sizes = [8, 2], strides = [1, 1]} : vector<8x12xf32> to vector<8x2xf32>
    %c32 = arith.constant 32 : index
    %c0_18 = arith.constant 0 : index
    %24 = vector.load %arg7[%c32, %c0_18] : memref<72x2xf32, #tpu.memory_space<vmem>>, vector<8x2xf32>
    tpu.vector_store %arg7[%c32, %c0_18], %23 {strides = array<i32>} : memref<72x2xf32, #tpu.memory_space<vmem>>, vector<8x2xf32>,
    %25 = vector.extract_strided_slice %18 {offsets = [0, 4], sizes = [8, 2], strides = [1, 1]} : vector<8x12xf32> to vector<8x2xf32>
    %c40 = arith.constant 40 : index
    %c0_19 = arith.constant 0 : index
    %26 = vector.load %arg7[%c40, %c0_19] : memref<72x2xf32, #tpu.memory_space<vmem>>, vector<8x2xf32>
    tpu.vector_store %arg7[%c40, %c0_19], %25 {strides = array<i32>} : memref<72x2xf32, #tpu.memory_space<vmem>>, vector<8x2xf32>,
    %27 = vector.extract_strided_slice %18 {offsets = [0, 6], sizes = [8, 2], strides = [1, 1]} : vector<8x12xf32> to vector<8x2xf32>
    %c48 = arith.constant 48 : index
    %c0_20 = arith.constant 0 : index
    %28 = vector.load %arg7[%c48, %c0_20] : memref<72x2xf32, #tpu.memory_space<vmem>>, vector<8x2xf32>
    tpu.vector_store %arg7[%c48, %c0_20], %27 {strides = array<i32>} : memref<72x2xf32, #tpu.memory_space<vmem>>, vector<8x2xf32>,
    %29 = vector.extract_strided_slice %18 {offsets = [0, 8], sizes = [8, 2], strides = [1, 1]} : vector<8x12xf32> to vector<8x2xf32>
    %c56 = arith.constant 56 : index
    %c0_21 = arith.constant 0 : index
    %30 = vector.load %arg7[%c56, %c0_21] : memref<72x2xf32, #tpu.memory_space<vmem>>, vector<8x2xf32>
    tpu.vector_store %arg7[%c56, %c0_21], %29 {strides = array<i32>} : memref<72x2xf32, #tpu.memory_space<vmem>>, vector<8x2xf32>,
    %31 = vector.extract_strided_slice %18 {offsets = [0, 10], sizes = [8, 2], strides = [1, 1]} : vector<8x12xf32> to vector<8x2xf32>
    %c64 = arith.constant 64 : index
    %c0_22 = arith.constant 0 : index
    %32 = vector.load %arg7[%c64, %c0_22] : memref<72x2xf32, #tpu.memory_space<vmem>>, vector<8x2xf32>
    tpu.vector_store %arg7[%c64, %c0_22], %31 {strides = array<i32>} : memref<72x2xf32, #tpu.memory_space<vmem>>, vector<8x2xf32>,
    %c0_23 = arith.constant 0 : index
    %c0_24 = arith.constant 0 : index
    %33 = vector.load %arg7[%c0_23, %c0_24] : memref<72x2xf32, #tpu.memory_space<vmem>>, vector<72x2xf32>
    %c0_25 = arith.constant 0 : index
    %c0_26 = arith.constant 0 : index
    %34 = vector.load %arg4[%c0_25, %c0_26] : memref<2x64xf32, #tpu.memory_space<vmem>>, vector<2x64xf32>
    %35 = vector.extract_strided_slice %33 {offsets = [0, 0], sizes = [72, 1], strides = [1, 1]} : vector<72x2xf32> to vector<72x1xf32>
    %36 = vector.extract_strided_slice %34 {offsets = [0, 0], sizes = [1, 64], strides = [1, 1]} : vector<2x64xf32> to vector<1x64xf32>
    %37 = vector.broadcast %35 : vector<72x1xf32> to vector<72x64xf32>
    %38 = vector.broadcast %36 : vector<1x64xf32> to vector<72x64xf32>
    %39 = arith.mulf %37, %38 : vector<72x64xf32>
    %40 = vector.extract_strided_slice %33 {offsets = [0, 1], sizes = [72, 1], strides = [1, 1]} : vector<72x2xf32> to vector<72x1xf32>
    %41 = vector.extract_strided_slice %34 {offsets = [1, 0], sizes = [1, 64], strides = [1, 1]} : vector<2x64xf32> to vector<1x64xf32>
    %42 = vector.broadcast %40 : vector<72x1xf32> to vector<72x64xf32>
    %43 = vector.broadcast %41 : vector<1x64xf32> to vector<72x64xf32>
    %44 = arith.mulf %42, %43 : vector<72x64xf32>
    %45 = arith.addf %39, %44 : vector<72x64xf32>
    %c0_27 = arith.constant 0 : index
    %c0_28 = arith.constant 0 : index
    %46 = vector.load %arg6[%c0_27, %c0_28] : memref<1x64xf32, #tpu.memory_space<vmem>>, vector<1x64xf32>
    %47 = vector.broadcast %46 : vector<1x64xf32> to vector<72x64xf32>
    %48 = arith.addf %45, %47 : vector<72x64xf32>
    %c0_29 = arith.constant 0 : index
    %c0_30 = arith.constant 0 : index
    %49 = vector.load %arg9[%c0_29, %c0_30] : memref<72x64xf32, #tpu.memory_space<vmem>>, vector<72x64xf32>
    tpu.vector_store %arg9[%c0_29, %c0_30], %48 {strides = array<i32>} : memref<72x64xf32, #tpu.memory_space<vmem>>, vector<72x64xf32>,
    %c0_31 = arith.constant 0 : index
    %c0_32 = arith.constant 0 : index
    %50 = vector.load %arg5[%c0_31, %c0_32] : memref<16x64xf32, #tpu.memory_space<vmem>>, vector<16x64xf32>
    %51 = tpu.iota {dimensions = array<i32: 1>} : vector<48x64xi32>
    %c32_i32 = arith.constant 32 : i32
    %52 = vector.broadcast %c32_i32 : i32 to vector<48x64xi32>
    %53 = arith.cmpi sge, %51, %52 : vector<48x64xi32>
    %c48_i32 = arith.constant 48 : i32
    %54 = vector.broadcast %c48_i32 : i32 to vector<48x64xi32>
    %55 = arith.cmpi slt, %51, %54 : vector<48x64xi32>
    %56 = arith.andi %53, %55 : vector<48x64xi1>
    %cst_33 = arith.constant 0.000000e+00 : f32
    %57 = vector.broadcast %cst_33 : f32 to vector<48x16xf32>
    %cst_34 = arith.constant 0.000000e+00 : f32
    %58 = vector.broadcast %cst_34 : f32 to vector<48x16xf32>
    %c0_35 = arith.constant 0 : index
    %c0_36 = arith.constant 0 : index
    %59 = vector.load %arg9[%c0_35, %c0_36] : memref<72x64xf32, #tpu.memory_space<vmem>>, vector<48x64xf32>
    %cst_37 = arith.constant dense<0.000000e+00> : vector<48x64xf32>
    %60 = tpu.matmul %57, %50, %cst_37 {dimension_numbers = #tpu.dot_dimension_numbers<[1], [0], [0], [1], [0, 0, 1, 1], [], []>} : vector<48x16xf32>, vector<16x64xf32>, vector<48x64xf32> -> vector<48x64xf32>
    %61 = arith.addf %59, %60 : vector<48x64xf32>
    %62 = math.tanh %61 : vector<48x64xf32>
    %63 = arith.negf %61 : vector<48x64xf32>
    %64 = math.exp %63 : vector<48x64xf32>
    %cst_38 = arith.constant 1.000000e+00 : f32
    %65 = vector.broadcast %cst_38 : f32 to vector<48x64xf32>
    %66 = arith.addf %65, %64 : vector<48x64xf32>
    %67 = arith.divf %65, %66 : vector<48x64xf32>
    %68 = arith.select %56, %62, %67 : vector<48x64xi1>, vector<48x64xf32>
    %69 = vector.extract_strided_slice %68 {offsets = [0, 0], sizes = [48, 16], strides = [1, 1]} : vector<48x64xf32> to vector<48x16xf32>
    %70 = vector.extract_strided_slice %68 {offsets = [0, 16], sizes = [48, 16], strides = [1, 1]} : vector<48x64xf32> to vector<48x16xf32>
    %71 = vector.extract_strided_slice %68 {offsets = [0, 32], sizes = [48, 16], strides = [1, 1]} : vector<48x64xf32> to vector<48x16xf32>
    %72 = vector.extract_strided_slice %68 {offsets = [0, 48], sizes = [48, 16], strides = [1, 1]} : vector<48x64xf32> to vector<48x16xf32>
    %73 = arith.mulf %70, %58 : vector<48x16xf32>
    %74 = arith.mulf %69, %71 : vector<48x16xf32>
    %75 = arith.addf %73, %74 : vector<48x16xf32>
    %76 = math.tanh %75 : vector<48x16xf32>
    %77 = arith.mulf %72, %76 : vector<48x16xf32>
    %c8 = arith.constant 8 : index
    %c0_39 = arith.constant 0 : index
    %78 = vector.load %arg9[%c8, %c0_39] : memref<72x64xf32, #tpu.memory_space<vmem>>, vector<48x64xf32>
    %cst_40 = arith.constant dense<0.000000e+00> : vector<48x64xf32>
    %79 = tpu.matmul %77, %50, %cst_40 {dimension_numbers = #tpu.dot_dimension_numbers<[1], [0], [0], [1], [0, 0, 1, 1], [], []>} : vector<48x16xf32>, vector<16x64xf32>, vector<48x64xf32> -> vector<48x64xf32>
    %80 = arith.addf %78, %79 : vector<48x64xf32>
    %81 = math.tanh %80 : vector<48x64xf32>
    %82 = arith.negf %80 : vector<48x64xf32>
    %83 = math.exp %82 : vector<48x64xf32>
    %cst_41 = arith.constant 1.000000e+00 : f32
    %84 = vector.broadcast %cst_41 : f32 to vector<48x64xf32>
    %85 = arith.addf %84, %83 : vector<48x64xf32>
    %86 = arith.divf %84, %85 : vector<48x64xf32>
    %87 = arith.select %56, %81, %86 : vector<48x64xi1>, vector<48x64xf32>
    %88 = vector.extract_strided_slice %87 {offsets = [0, 0], sizes = [48, 16], strides = [1, 1]} : vector<48x64xf32> to vector<48x16xf32>
    %89 = vector.extract_strided_slice %87 {offsets = [0, 16], sizes = [48, 16], strides = [1, 1]} : vector<48x64xf32> to vector<48x16xf32>
    %90 = vector.extract_strided_slice %87 {offsets = [0, 32], sizes = [48, 16], strides = [1, 1]} : vector<48x64xf32> to vector<48x16xf32>
    %91 = vector.extract_strided_slice %87 {offsets = [0, 48], sizes = [48, 16], strides = [1, 1]} : vector<48x64xf32> to vector<48x16xf32>
    %92 = arith.mulf %89, %75 : vector<48x16xf32>
    %93 = arith.mulf %88, %90 : vector<48x16xf32>
    %94 = arith.addf %92, %93 : vector<48x16xf32>
    %95 = math.tanh %94 : vector<48x16xf32>
    %96 = arith.mulf %91, %95 : vector<48x16xf32>
    %c16 = arith.constant 16 : index
    %c0_42 = arith.constant 0 : index
    %97 = vector.load %arg9[%c16, %c0_42] : memref<72x64xf32, #tpu.memory_space<vmem>>, vector<48x64xf32>
    %cst_43 = arith.constant dense<0.000000e+00> : vector<48x64xf32>
    %98 = tpu.matmul %96, %50, %cst_43 {dimension_numbers = #tpu.dot_dimension_numbers<[1], [0], [0], [1], [0, 0, 1, 1], [], []>} : vector<48x16xf32>, vector<16x64xf32>, vector<48x64xf32> -> vector<48x64xf32>
    %99 = arith.addf %97, %98 : vector<48x64xf32>
    %100 = math.tanh %99 : vector<48x64xf32>
    %101 = arith.negf %99 : vector<48x64xf32>
    %102 = math.exp %101 : vector<48x64xf32>
    %cst_44 = arith.constant 1.000000e+00 : f32
    %103 = vector.broadcast %cst_44 : f32 to vector<48x64xf32>
    %104 = arith.addf %103, %102 : vector<48x64xf32>
    %105 = arith.divf %103, %104 : vector<48x64xf32>
    %106 = arith.select %56, %100, %105 : vector<48x64xi1>, vector<48x64xf32>
    %107 = vector.extract_strided_slice %106 {offsets = [0, 0], sizes = [48, 16], strides = [1, 1]} : vector<48x64xf32> to vector<48x16xf32>
    %108 = vector.extract_strided_slice %106 {offsets = [0, 16], sizes = [48, 16], strides = [1, 1]} : vector<48x64xf32> to vector<48x16xf32>
    %109 = vector.extract_strided_slice %106 {offsets = [0, 32], sizes = [48, 16], strides = [1, 1]} : vector<48x64xf32> to vector<48x16xf32>
    %110 = vector.extract_strided_slice %106 {offsets = [0, 48], sizes = [48, 16], strides = [1, 1]} : vector<48x64xf32> to vector<48x16xf32>
    %111 = arith.mulf %108, %94 : vector<48x16xf32>
    %112 = arith.mulf %107, %109 : vector<48x16xf32>
    %113 = arith.addf %111, %112 : vector<48x16xf32>
    %114 = math.tanh %113 : vector<48x16xf32>
    %115 = arith.mulf %110, %114 : vector<48x16xf32>
    %c24_45 = arith.constant 24 : index
    %c0_46 = arith.constant 0 : index
    %116 = vector.load %arg9[%c24_45, %c0_46] : memref<72x64xf32, #tpu.memory_space<vmem>>, vector<48x64xf32>
    %cst_47 = arith.constant dense<0.000000e+00> : vector<48x64xf32>
    %117 = tpu.matmul %115, %50, %cst_47 {dimension_numbers = #tpu.dot_dimension_numbers<[1], [0], [0], [1], [0, 0, 1, 1], [], []>} : vector<48x16xf32>, vector<16x64xf32>, vector<48x64xf32> -> vector<48x64xf32>
    %118 = arith.addf %116, %117 : vector<48x64xf32>
    %119 = math.tanh %118 : vector<48x64xf32>
    %120 = arith.negf %118 : vector<48x64xf32>
    %121 = math.exp %120 : vector<48x64xf32>
    %cst_48 = arith.constant 1.000000e+00 : f32
    %122 = vector.broadcast %cst_48 : f32 to vector<48x64xf32>
    %123 = arith.addf %122, %121 : vector<48x64xf32>
    %124 = arith.divf %122, %123 : vector<48x64xf32>
    %125 = arith.select %56, %119, %124 : vector<48x64xi1>, vector<48x64xf32>
    %126 = vector.extract_strided_slice %125 {offsets = [0, 0], sizes = [48, 16], strides = [1, 1]} : vector<48x64xf32> to vector<48x16xf32>
    %127 = vector.extract_strided_slice %125 {offsets = [0, 16], sizes = [48, 16], strides = [1, 1]} : vector<48x64xf32> to vector<48x16xf32>
    %128 = vector.extract_strided_slice %125 {offsets = [0, 32], sizes = [48, 16], strides = [1, 1]} : vector<48x64xf32> to vector<48x16xf32>
    %129 = vector.extract_strided_slice %125 {offsets = [0, 48], sizes = [48, 16], strides = [1, 1]} : vector<48x64xf32> to vector<48x16xf32>
    %130 = arith.mulf %127, %113 : vector<48x16xf32>
    %131 = arith.mulf %126, %128 : vector<48x16xf32>
    %132 = arith.addf %130, %131 : vector<48x16xf32>
    %133 = math.tanh %132 : vector<48x16xf32>
    %134 = arith.mulf %129, %133 : vector<48x16xf32>
    %c0_49 = arith.constant 0 : index
    %c0_50 = arith.constant 0 : index
    %c0_51 = arith.constant 0 : index
    %135 = vector.load %arg8[%c0_49, %c0_50, %c0_51] : memref<2x48x16xf32, #tpu.memory_space<vmem>>, vector<1x48x16xf32>
    %136 = vector.shape_cast %135 : vector<1x48x16xf32> to vector<48x16xf32>
    %137 = vector.shape_cast %134 : vector<48x16xf32> to vector<1x48x16xf32>
    tpu.vector_store %arg8[%c0_49, %c0_50, %c0_51], %137 {strides = array<i32>} : memref<2x48x16xf32, #tpu.memory_space<vmem>>, vector<1x48x16xf32>,
    %c1 = arith.constant 1 : index
    %c0_52 = arith.constant 0 : index
    %c0_53 = arith.constant 0 : index
    %138 = vector.load %arg8[%c1, %c0_52, %c0_53] : memref<2x48x16xf32, #tpu.memory_space<vmem>>, vector<1x48x16xf32>
    %139 = vector.shape_cast %138 : vector<1x48x16xf32> to vector<48x16xf32>
    %140 = vector.shape_cast %132 : vector<48x16xf32> to vector<1x48x16xf32>
    tpu.vector_store %arg8[%c1, %c0_52, %c0_53], %140 {strides = array<i32>} : memref<2x48x16xf32, #tpu.memory_space<vmem>>, vector<1x48x16xf32>,
    return
  }
}

</mosaic_0001>

<bundles_post_ra>
// kernel: tpu_custom_call.1
= control target key start
LH: loop header
LB: loop body
LE: loop exit
PB: predicated region body
PF: predicated region fallthrough
CT: control target
= control target key end

     0   :  { %14 = vsyncpa [#allocation4], 0  ;;  %s2878_s0 = inlined_call_operand.hbm [shape: f32[3,8,8], index: 0, kind: input, shape index: {}]   ;;  %s2879_s1 = inlined_call_operand.hbm [shape: f32[3,8,8], index: 1, kind: input, shape index: {}]   ;;  %s2880_s2 = inlined_call_operand.hbm [shape: f32[8,8], index: 2, kind: input, shape index: {}]   ;;  %s2881_s3 = inlined_call_operand.hbm [shape: f32[8,12], index: 3, kind: input, shape index: {}]   ;;  %s2882_s4 = inlined_call_operand.vmem [shape: f32[2,64], index: 4, kind: input, shape index: {}]   ;;  %s2883_s5 = inlined_call_operand.hbm [shape: f32[16,64], index: 5, kind: input, shape index: {}]   ;;  %s2884_s6 = inlined_call_operand.vmem [shape: f32[1,64], index: 6, kind: input, shape index: {}]   ;;  %s2885_s7 = inlined_call_operand.vmem [shape: f32[72,2], index: 7, kind: output, shape index: {0}]   ;;  %s2886_s8 = inlined_call_operand.vmem [shape: f32[2,48,16], index: 8, kind: output, shape index: {1}]  }
   0x1   :  { %15 = vsyncpa [#allocation6], 0 }
   0x2   :  { %16 = vsyncpa [#allocation9], 0  ;;  %s2147_s27 = smov [#allocation5]   ;;  %s2148_s29 = smov [#allocation8]  }
   0x3   :  { %s34_s28 = sshll.u32 %s2147_s27, 4  ;;  %s57_s30 = sshll.u32 %s2148_s29, 4  ;;  %s35_s28 = int_to_ptr.vmem [resolvable:$true] %s34_s28  ;;  %s58_s30 = int_to_ptr.vmem [resolvable:$true] %s57_s30 }
   0x4   :  { %s2049_s9 = scalar_lea.vmem %s35_s28, 384  ;;  %p2054_p1 = scmp.lt.s32.totalorder %s35_s28, %s35_s28 }
   0x5   :  { %p2050_p0 = scmp.ne.s32.totalorder %s35_s28, %s2049_s9  ;;  %p2055_p2 = scmp.lt.s32.totalorder %s2049_s9, %s2049_s9 }
   0x7   :  { %p2056_p3 = por %p2055_p2, %p2054_p1 }
   0x9   :  { %p2057_p4 = pnand %p2056_p3, %p2050_p0 }
   0xb   :  { %2060 = shalt.err (!%p2057_p4)
}
   0xc   :  { %s2149_s10 = smov 128   ;;  %s2150_s11 = smov 8  }
   0xd   :  { %40 = dma.hbm_to_vmem [thread:$0]  %s2879_s1, 384, %s35_s28, [#allocation6], %s2149_s10, %s2149_s10, %s2150_s11  }
   0xe   :  { %s2069_s14 = scalar_lea.vmem %s58_s30, 128  ;;  %p2074_p6 = scmp.lt.s32.totalorder %s58_s30, %s58_s30 }
   0xf   :  { %p2070_p5 = scmp.ne.s32.totalorder %s58_s30, %s2069_s14  ;;  %p2075_p7 = scmp.lt.s32.totalorder %s2069_s14, %s2069_s14 }
  0x11   :  { %p2076_p8 = por %p2075_p7, %p2074_p6 }
  0x13   :  { %p2077_p9 = pnand %p2076_p8, %p2070_p5 }
  0x15   :  { %2080 = shalt.err (!%p2077_p9)
}
  0x16   :  { %60 = dma.hbm_to_vmem [thread:$0]  %s2881_s3, 128, %s58_s30, [#allocation9]  }
  0x17   :  { %s2151_s17 = smov [#allocation3]   ;;  %s2152_s19 = smov [#allocation7]  }
  0x18   :  { %s22_s18 = sshll.u32 %s2151_s17, 4  ;;  %s47_s20 = sshll.u32 %s2152_s19, 4  ;;  %s23_s18 = int_to_ptr.vmem [resolvable:$true] %s22_s18  ;;  %s48_s20 = int_to_ptr.vmem [resolvable:$true] %s47_s20 }
  0x19   :  { %s2089_s21 = scalar_lea.vmem %s23_s18, 384  ;;  %p2094_p11 = scmp.lt.s32.totalorder %s23_s18, %s23_s18 }
  0x1a   :  { %p2090_p10 = scmp.ne.s32.totalorder %s23_s18, %s2089_s21  ;;  %p2095_p12 = scmp.lt.s32.totalorder %s2089_s21, %s2089_s21 }
  0x1c   :  { %p2096_p13 = por %p2095_p12, %p2094_p11 }
  0x1e   :  { %p2097_p0 = pnand %p2096_p13, %p2090_p10 }
  0x20   :  { %2100 = shalt.err (!%p2097_p0)
}
  0x21   :  { %28 = dma.hbm_to_vmem [thread:$0]  %s2878_s0, 384, %s23_s18, [#allocation4], %s2149_s10, %s2149_s10, %s2150_s11  }
  0x22   :  { %s2109_s3 = scalar_lea.vmem %s48_s20, 128  ;;  %p2114_p2 = scmp.lt.s32.totalorder %s48_s20, %s48_s20 }
  0x23   :  { %p2110_p1 = scmp.ne.s32.totalorder %s48_s20, %s2109_s3  ;;  %p2115_p3 = scmp.lt.s32.totalorder %s2109_s3, %s2109_s3 }
  0x25   :  { %p2116_p4 = por %p2115_p3, %p2114_p2 }
  0x27   :  { %p2117_p5 = pnand %p2116_p4, %p2110_p1 }
  0x29   :  { %2120 = shalt.err (!%p2117_p5)
}
  0x2a   :  { %50 = dma.hbm_to_vmem [thread:$0]  %s2880_s2, 128, %s48_s20, [#allocation6]  }
  0x2b   :  { %s2153_s25 = smov [#allocation10]  }
  0x2c   :  { %s68_s26 = sshll.u32 %s2153_s25, 4  ;;  %s69_s26 = int_to_ptr.vmem [resolvable:$true] %s68_s26 }
  0x2d   :  { %s2129_s27 = scalar_lea.vmem %s69_s26, 256  ;;  %p2134_p7 = scmp.lt.s32.totalorder %s69_s26, %s69_s26 }
  0x2e   :  { %p2130_p6 = scmp.ne.s32.totalorder %s69_s26, %s2129_s27  ;;  %p2135_p8 = scmp.lt.s32.totalorder %s2129_s27, %s2129_s27 }
  0x30   :  { %p2136_p9 = por %p2135_p8, %p2134_p7 }
  0x32   :  { %p2137_p10 = pnand %p2136_p9, %p2130_p6 }
  0x34   :  { %2140 = shalt.err (!%p2137_p10)
}
  0x35   :  { %74 = dma.hbm_to_vmem [thread:$0]  %s2883_s5, 256, %s69_s26, [#allocation9], %s2149_s10, %s2149_s10, %s2150_s11  }
  0x36   :  { %2141 = dma.done.wait [#allocation4], 384  }
  0x37   :  { %2142 = vsyncadd [#allocation4], 4294966912 }
  0x38   :  { %2143 = dma.done.wait [#allocation6], 512  }
  0x39   :  { %2144 = vsyncadd [#allocation6], 4294966784 }
  0x3a   :  { %2145 = dma.done.wait [#allocation9], 384  }
  0x3b   :  { %2146 = vsyncadd [#allocation9], 4294966912  ;;  %v2154_v0 = vmov 0.0   ;;  %vm2155_vm0 = vmmov 0   ;;  %vm95_vm1 = vcmask 64512   ;;  %v130_v1 = vld [vmem:[#allocation7] sm:$0xff]  ;;  %v360_v49 = vlaneseq }
  0x3c   :  { %1745 = vmatprep.subr.mxu0 %v2154_v0  ;;  %1747 = vmatprep.mubr.msk.f32.mxu0 %vm2155_vm0, %v2154_v0  ;;  %v92_v2 = vld [vmem:[#allocation5] sm:$0xff]  ;;  %v93_v3 = vld [vmem:[#allocation5 + $0x8] sm:$0xff]  ;;  %v94_v4 = vld [vmem:[#allocation5 + $0x10] sm:$0xff]  ;;  %vm279_vm2 = vcmask 15360   ;;  %v2156_v42 = vmov 0   ;;  %v2157_v43 = vmov 1  }
  0x3d   :  { %1750 = vmatprep.subr.mxu1 %v2154_v0  ;;  %1752 = vmatprep.mubr.msk.f32.mxu1 %vm2155_vm0, %v2154_v0  ;;  %v96_v5 = vsel %vm95_vm1, %v92_v2, -inf  ;;  %v97_v6 = vsel %vm95_vm1, %v93_v3, -inf  ;;  %v98_v7 = vsel %vm95_vm1, %v94_v4, -inf  ;;  %v119_v25 = vld [vmem:[#allocation3] sm:$0xff]  ;;  %v120_v26 = vld [vmem:[#allocation3 + $0x8] sm:$0xff]  ;;  %v121_v27 = vld [vmem:[#allocation3 + $0x10] sm:$0xff] }
  0x3e   :  { %1746 = vmatpush3.msra.mxu0 %v130_v1  ;;  %v99_v8 = vmax.f32 %v96_v5, %v97_v6  ;;  %v204_v39 = vld [vmem:[#allocation8] sm:$0xff]  ;;  %v2252_v40 = vld [vmem:[#allocation10 + $0x8] sm:$0xff]  ;;  %v2254_v41 = vld [vmem:[#allocation10] sm:$0xff]  ;;  %1828 = vset.pattern.permute.xlu1 %v2156_v42  ;;  %280 = vst.msk [vmem:[%s2885_s7] sm:$0xff] %vm279_vm2, %v2154_v0  ;;  %v361_v51 = vshrl.u32 %v360_v49, 7  ;;  %vm447_vm3 = vcmask 523264  }
  0x3f   :  { %1751 = vmatpush3.msra.mxu1 %v204_v39  ;;  %1755 = vmatprep.subr.mxu0 %v2252_v40  ;;  %281 = vst.msk [vmem:[%s2885_s7 + $0x8] sm:$0xff] %vm279_vm2, %v2154_v0  ;;  %282 = vst.msk [vmem:[%s2885_s7 + $0x10] sm:$0xff] %vm279_vm2, %v2154_v0  ;;  %v314_v52 = vld [vmem:[%s2882_s4] sm:$0x3]  ;;  %s2158_s1 = smov 126   ;;  %s2159_s22 = smov 124  }
  0x40   :  { %v100_v9 = vmax.f32 %v99_v8, %v98_v7  ;;  %1831 = vset.pattern.permute.xlu0 %v2157_v43  ;;  %1768 = vmatprep.subr.mxu1 %v2252_v40  ;;  %v362_v53 = vsub.s32 0, %v361_v51  ;;  %v411_v54 = vsub.s32 1, %v361_v51  ;;  %v2315_v60 = vld [vmem:[%s2884_s6] ss:$0 sm:$0xff]  ;;  %s2160_s29 = smov 96   ;;  %s2161_s30 = smov 16  }
  0x41   :  { %s2162_s9 = smov 32   ;;  %s2163_s10 = smov 80   ;;  %vm470_vm7 = vcmask 130048  }
  0x42   :  { %v101_v10 = vsub.f32 %v92_v2, %v100_v9  ;;  %v102_v11 = vsub.f32 %v93_v3, %v100_v9  ;;  %v103_v12 = vsub.f32 %v94_v4, %v100_v9  ;;  %v2306_v56 = vrot.slane %v314_v52, %v362_v53  ;;  %s2164_s11 = smov 122   ;;  %s2165_s16 = smov 120  }
  0x43   :  { %v2308_v57 = vrot.slane %v314_v52, %v411_v54  ;;  %s2166_s4 = smov 118  }
  0x44   :  { %v104_v13 = vmul.f32 1.442695, %v101_v10  ;;  %v106_v14 = vmul.f32 1.442695, %v102_v11  ;;  %v108_v15 = vmul.f32 1.442695, %v103_v12 }
  0x45   :  { %v305_v44 = vld [vmem:[%s2885_s7] sm:$0xff]  ;;  %v460_v12 = vand.u32 127, %v360_v49 }
  0x46   :  { %1839 = vpow2.f32 %v104_v13  ;;  %317 = vperm.xlu1 %1828, %v305_v44   ;;  %v306_v47 = vld [vmem:[%s2885_s7 + $0x8] sm:$0xff]  ;;  %v307_v48 = vld [vmem:[%s2885_s7 + $0x10] sm:$0xff] }
  0x47   :  { %1841 = vpow2.f32 %v106_v14  ;;  %vm461_vm4 = vcmp.ge.s32.totalorder %v460_v12, 32  ;;  %vm462_vm5 = vcmp.lt.s32.totalorder %v460_v12, 48 }
  0x48   :  { %1843 = vpow2.f32 %v108_v15  ;;  %vm2344_vm6 = vmand %vm461_vm4, %vm462_vm5 }
  0x4a   :  { %1829 = vset.pattern.permute.xlu1 %v2157_v43 }
  0x4b   :  { %374 = vperm.xlu1 %1829, %v305_v44  }
  0x4f   :  { %378 = vperm.xlu1 %1829, %v306_v47  }
  0x53   :  { %v1840_v16 = vpop.eup %1839  ;;  %1830 = vset.pattern.permute.xlu1 %v2156_v42 }
  0x54   :  { %v1842_v17 = vpop.eup %1841  ;;  %v110_v18 = vsel %vm95_vm1, %v1840_v16, 0.0  ;;  %327 = vperm.xlu1 %1830, %v307_v48  }
  0x55   :  { %v1844_v19 = vpop.eup %1843  ;;  %v111_v20 = vsel %vm95_vm1, %v1842_v17, 0.0 }
  0x56   :  { %v112_v21 = vadd.f32 %v111_v20, %v110_v18  ;;  %v113_v22 = vsel %vm95_vm1, %v1844_v19, 0.0 }
  0x58   :  { %v114_v23 = vadd.f32 %v113_v22, %v112_v21 }
  0x5a   :  { %1845 = vrcp.f32 %v114_v23 }
  0x67   :  { %v1846_v24 = vpop.eup %1845 }
  0x68   :  { %v116_v28 = vmul.f32 %v1846_v24, %v1840_v16  ;;  %v117_v29 = vmul.f32 %v1846_v24, %v1842_v17  ;;  %v118_v30 = vmul.f32 %v1846_v24, %v1844_v19 }
  0x6a   :  { %v122_v31 = vmul.f32 %v119_v25, %v116_v28  ;;  %v123_v32 = vmul.f32 %v120_v26, %v117_v29  ;;  %v124_v33 = vmul.f32 %v121_v27, %v118_v30 }
  0x6c   :  { %v125_v34 = vsel %vm95_vm1, %v122_v31, 0.0  ;;  %v126_v35 = vsel %vm95_vm1, %v123_v32, 0.0  ;;  %v128_v36 = vsel %vm95_vm1, %v124_v33, 0.0 }
  0x6d   :  { %v127_v37 = vadd.f32 %v126_v35, %v125_v34 }
  0x6f   :  { %v129_v38 = vadd.f32 %v128_v36, %v127_v37 }
  0x71   :  { %1748 = vmatmul.mubr.msk.f32.vlgmr.msra.gmra.mxu0 %vm95_vm1, %v129_v38 }
  0x72   :  { %1759 = vmatprep.mubr.f32.mxu0 %v2154_v0  ;;  %1756 = vmatpush3.msra.mxu0 %v2252_v40 }
  0x73   :  { %1757 = vmatprep.subr.mxu0 %v2254_v41 }
  0x74   :  { %1758 = vmatpush3.msra.mxu0 %v2254_v41 }
  0x75   :  { %1760 = vmatmul.mubr.f32.vlgmr.msra.gmra.mxu0 %v2154_v0  ;;  %1781 = vmatprep.subr.mxu0 %v2252_v40 }
  0x76   :  { %1762 = vmatprep.mubr.f32.mxu0 %v2154_v0  ;;  %1782 = vmatpush3.msra.mxu0 %v2252_v40 }
  0x77   :  { %1783 = vmatprep.subr.mxu0 %v2254_v41 }
  0x78   :  { %1784 = vmatpush3.msra.mxu0 %v2254_v41 }
  0x79   :  { %1763 = vmatmul.mubr.f32.gmra.mxu0 %v2154_v0 }
  0x7a   :  { %1765 = vmatprep.mubr.f32.mxu0 %v2154_v0 }
  0x7d   :  { %1766 = vmatmul.mubr.f32.gmra.mxu0 %v2154_v0 }
  0xc1   :  { %v318_v50 = vpop.permute.xlu1 %317 }
  0xc2   :  { %v364_v58 = vmul.f32 %v2306_v56, %v318_v50 }
  0xc6   :  { %v375_v55 = vpop.permute.xlu1 %374 }
  0xc7   :  { %v413_v59 = vmul.f32 %v2308_v57, %v375_v55 }
  0xc9   :  { %v422_v61 = vadd.f32 %v413_v59, %v364_v58 }
  0xca   :  { %v379_v13 = vpop.permute.xlu1 %378 }
  0xcb   :  { %v438_v62 = vadd.f32 %v2315_v60, %v422_v61  ;;  %v414_v26 = vmul.f32 %v2308_v57, %v379_v13 }
  0xcd   :  { %448 = vst.msk [vmem:[#allocation2] sm:$0xff] %vm447_vm3, %v438_v62 }
  0xcf   :  { %v328_v16 = vpop.permute.xlu1 %327 }
  0xd0   :  { %v366_v21 = vmul.f32 %v2306_v56, %v328_v16 }
  0xd4   :  { %v464_v4 = vld [vmem:[#allocation2] sm:$0xff] }
 0x131   :  { %v200_v45 = vpop.f32.mrf.mxu0 }
 0x132   :  { %1753 = vmatmul.mubr.msk.f32.vlgmr.msra.gmra.mxu1 %vm95_vm1, %v200_v45 }
 0x133   :  { %v1749_v46 = vpop.f32.mrf.mxu0  ;;  %1769 = vmatpush3.msra.mxu1 %v2252_v40 }
 0x134   :  { %1770 = vmatprep.subr.mxu1 %v2254_v41 }
 0x135   :  { %1771 = vmatpush3.msra.mxu1 %v2254_v41  ;;  %v1761_v3 = vpop.f32.mrf.mxu0 }
 0x136   :  { %1794 = vmatprep.subr.mxu1 %v2252_v40 }
 0x137   :  { %v540_v5 = vpop.f32.mrf.mxu0 }
 0x138   :  { %v569_v6 = vadd.f32 %v540_v5, %v464_v4 }
 0x139   :  { %v1764_v35 = vpop.f32.mrf.mxu0 }
 0x13a   :  { %v1661_v7 = vmul.f32 -1.442695, %v569_v6 }
 0x13b   :  { %v550_v38 = vpop.f32.mrf.mxu0 }
 0x13c   :  { %1847 = vpow2.f32 %v1661_v7 }
 0x13d   :  { %1849 = vtanh.f32 %v569_v6 }
 0x149   :  { %v1848_v8 = vpop.eup %1847 }
 0x14a   :  { %v599_v9 = vadd.f32 1.0, %v1848_v8  ;;  %v1850_v15 = vpop.eup %1849 }
 0x14c   :  { %1851 = vrcp.f32 %v599_v9 }
 0x159   :  { %v1852_v17 = vpop.eup %1851 }
 0x15a   :  { %v2355_v20 = vsel %vm2344_vm6, %v1850_v15, %v1852_v17 }
 0x1f2   :  { %v274_v63 = vpop.f32.mrf.mxu1 }
 0x1f3   :  { %v2319_v0 = vmax.f32 %v274_v63, 0.0 }
 0x1f4   :  { %v1754_v1 = vpop.f32.mrf.mxu1 }
 0x1f5   :  { %283 = vst.msk [vmem:[%s2885_s7 + $0x18] sm:$0xff] %vm279_vm2, %v2319_v0  ;;  %285 = vrot.lane.b32.xlu0 %v2319_v0, %s2158_s1 }
 0x1f9   :  { %289 = vrot.lane.b32.xlu0 %v2319_v0, %s2159_s22 }
 0x1fc   :  { %v308_v2 = vld [vmem:[%s2885_s7 + $0x18] sm:$0xff] }
 0x1fd   :  { %382 = vperm.xlu0 %1831, %v307_v48   ;;  %332 = vperm.xlu1 %1830, %v308_v2  }
 0x201   :  { %1832 = vset.pattern.permute.xlu0 %v2156_v42  ;;  %1833 = vset.pattern.permute.xlu1 %v2157_v43 }
 0x202   :  { %322 = vperm.xlu0 %1832, %v306_v47   ;;  %386 = vperm.xlu1 %1833, %v308_v2  }
 0x267   :  { %v286_v10 = vpop.permute.xlu0 %285 }
 0x268   :  { %288 = vst.msk [vmem:[%s2885_s7 + $0x20] sm:$0xff] %vm279_vm2, %v286_v10 }
 0x26b   :  { %v290_v11 = vpop.permute.xlu0 %289 }
 0x26c   :  { %292 = vst.msk [vmem:[%s2885_s7 + $0x28] sm:$0xff] %vm279_vm2, %v290_v11 }
 0x26f   :  { %v309_v14 = vld [vmem:[%s2885_s7 + $0x20] sm:$0xff] }
 0x270   :  { %337 = vperm.xlu0 %1832, %v309_v14   ;;  %390 = vperm.xlu1 %1833, %v309_v14  }
 0x273   :  { %v310_v19 = vld [vmem:[%s2885_s7 + $0x28] sm:$0xff] }
 0x274   :  { %1835 = vset.pattern.permute.xlu0 %v2157_v43  ;;  %1834 = vset.pattern.permute.xlu1 %v2156_v42 }
 0x275   :  { %394 = vperm.xlu0 %1835, %v310_v19   ;;  %342 = vperm.xlu1 %1834, %v310_v19   ;;  %v1767_v19 = vpop.f32.mrf.mxu0 }
 0x278   :  { %v383_v22 = vpop.permute.xlu0 %382  ;;  %v333_v23 = vpop.permute.xlu1 %332 }
 0x279   :  { %v415_v24 = vmul.f32 %v2308_v57, %v383_v22  ;;  %635 = vrot.lane.b32.xlu1 %v2355_v20, %s2160_s29  ;;  %v367_v30 = vmul.f32 %v2306_v56, %v333_v23  ;;  %v560_v22 = vpop.f32.mrf.mxu0 }
 0x27b   :  { %v424_v25 = vadd.f32 %v415_v24, %v366_v21 }
 0x27d   :  { %v440_v27 = vadd.f32 %v2315_v60, %v424_v25  ;;  %v323_v28 = vpop.permute.xlu0 %322  ;;  %v387_v29 = vpop.permute.xlu1 %386 }
 0x27e   :  { %v365_v31 = vmul.f32 %v2306_v56, %v323_v28  ;;  %v416_v32 = vmul.f32 %v2308_v57, %v387_v29 }
 0x27f   :  { %450 = vst.msk [vmem:[#allocation2 + $0x10] sm:$0xff] %vm447_vm3, %v440_v27 }
 0x280   :  { %v423_v33 = vadd.f32 %v414_v26, %v365_v31  ;;  %v425_v34 = vadd.f32 %v416_v32, %v367_v30 }
 0x282   :  { %v439_v36 = vadd.f32 %v2315_v60, %v423_v33  ;;  %v441_v37 = vadd.f32 %v2315_v60, %v425_v34 }
 0x284   :  { %449 = vst.msk [vmem:[#allocation2 + $0x8] sm:$0xff] %vm447_vm3, %v439_v36  ;;  %451 = vst.msk [vmem:[#allocation2 + $0x18] sm:$0xff] %vm447_vm3, %v441_v37 }
 0x286   :  { %v2371_v39 = vld [vmem:[#allocation2 + $0x10] sm:$0xff] }
 0x287   :  { %v571_v44 = vadd.f32 %v550_v38, %v2371_v39 }
 0x289   :  { %v1663_v45 = vmul.f32 -1.442695, %v571_v44 }
 0x28b   :  { %v2374_v46 = vld [vmem:[#allocation2 + $0x18] sm:$0xff]  ;;  %1853 = vpow2.f32 %v1663_v45  ;;  %v2376_v47 = vld [vmem:[#allocation2 + $0x8] sm:$0xff] }
 0x28c   :  { %v572_v48 = vadd.f32 %v1764_v35, %v2374_v46  ;;  %v570_v49 = vadd.f32 %v1761_v3, %v2376_v47 }
 0x28e   :  { %v1664_v50 = vmul.f32 -1.442695, %v572_v48  ;;  %v1662_v51 = vmul.f32 -1.442695, %v570_v49 }
 0x290   :  { %1855 = vpow2.f32 %v1664_v50 }
 0x291   :  { %1857 = vpow2.f32 %v1662_v51 }
 0x292   :  { %1859 = vtanh.f32 %v571_v44 }
 0x298   :  { %v1854_v52 = vpop.eup %1853 }
 0x299   :  { %v601_v53 = vadd.f32 1.0, %v1854_v52 }
 0x29b   :  { %1861 = vrcp.f32 %v601_v53 }
 0x29c   :  { %1863 = vtanh.f32 %v570_v49 }
 0x29d   :  { %v1856_v54 = vpop.eup %1855 }
 0x29e   :  { %v1858_v55 = vpop.eup %1857  ;;  %v602_v58 = vadd.f32 1.0, %v1856_v54 }
 0x29f   :  { %v600_v59 = vadd.f32 1.0, %v1858_v55  ;;  %v1860_v61 = vpop.eup %1859 }
 0x2a1   :  { %1865 = vrcp.f32 %v600_v59 }
 0x2a2   :  { %1867 = vrcp.f32 %v602_v58  ;;  %v623_v58 = vmul.f32 0.0, %v2355_v20 }
 0x2a3   :  { %1869 = vtanh.f32 %v572_v48 }
 0x2a8   :  { %v1862_v62 = vpop.eup %1861 }
 0x2a9   :  { %v2382_v63 = vsel %vm2344_vm6, %v1860_v61, %v1862_v62  ;;  %v1864_v1 = vpop.eup %1863 }
 0x2aa   :  { %639 = vrot.lane.b32.xlu0 %v2382_v63, %s2160_s29 }
 0x2ae   :  { %v1866_v2 = vpop.eup %1865 }
 0x2af   :  { %v2388_v3 = vsel %vm2344_vm6, %v1864_v1, %v1866_v2  ;;  %v1868_v4 = vpop.eup %1867  ;;  %v625_v2 = vmul.f32 0.0, %v2382_v63 }
 0x2b0   :  { %637 = vrot.lane.b32.xlu1 %v2388_v3, %s2160_s29  ;;  %v1870_v5 = vpop.eup %1869 }
 0x2b1   :  { %v2394_v6 = vsel %vm2344_vm6, %v1870_v5, %v1868_v4  ;;  %v624_v5 = vmul.f32 0.0, %v2388_v3 }
 0x2b4   :  { %641 = vrot.lane.b32.xlu1 %v2394_v6, %s2160_s29 }
 0x2eb   :  { %v338_v7 = vpop.permute.xlu0 %337  ;;  %v391_v8 = vpop.permute.xlu1 %390 }
 0x2ec   :  { %v368_v9 = vmul.f32 %v2306_v56, %v338_v7  ;;  %v417_v10 = vmul.f32 %v2308_v57, %v391_v8 }
 0x2ee   :  { %v426_v11 = vadd.f32 %v417_v10, %v368_v9  ;;  %v626_v10 = vmul.f32 0.0, %v2394_v6 }
 0x2f0   :  { %v442_v12 = vadd.f32 %v2315_v60, %v426_v11  ;;  %v395_v13 = vpop.permute.xlu0 %394  ;;  %v343_v14 = vpop.permute.xlu1 %342 }
 0x2f1   :  { %v418_v15 = vmul.f32 %v2308_v57, %v395_v13  ;;  %v369_v16 = vmul.f32 %v2306_v56, %v343_v14 }
 0x2f2   :  { %452 = vst.msk [vmem:[#allocation2 + $0x20] sm:$0xff] %vm447_vm3, %v442_v12 }
 0x2f3   :  { %v427_v17 = vadd.f32 %v418_v15, %v369_v16 }
 0x2f4   :  { %v636_v35 = vpop.permute.xlu1 %635 }
 0x2f5   :  { %v443_v21 = vadd.f32 %v2315_v60, %v427_v17  ;;  %v653_v38 = vmul.f32 %v636_v35, %v2355_v20 }
 0x2f7   :  { %453 = vst.msk [vmem:[#allocation2 + $0x28] sm:$0xff] %vm447_vm3, %v443_v21 }
 0x2f9   :  { %v2406_v23 = vld [vmem:[#allocation2 + $0x20] sm:$0xff] }
 0x2fa   :  { %v573_v24 = vadd.f32 %v560_v22, %v2406_v23 }
 0x2fc   :  { %v1665_v25 = vmul.f32 -1.442695, %v573_v24 }
 0x2fe   :  { %v2409_v26 = vld [vmem:[#allocation2 + $0x28] sm:$0xff]  ;;  %1871 = vpow2.f32 %v1665_v25 }
 0x2ff   :  { %v574_v27 = vadd.f32 %v1767_v19, %v2409_v26 }
 0x301   :  { %v1666_v28 = vmul.f32 -1.442695, %v574_v27 }
 0x303   :  { %1873 = vpow2.f32 %v1666_v28 }
 0x304   :  { %1875 = vtanh.f32 %v573_v24 }
 0x30b   :  { %v1872_v29 = vpop.eup %1871 }
 0x30c   :  { %v603_v30 = vadd.f32 1.0, %v1872_v29 }
 0x30e   :  { %1877 = vrcp.f32 %v603_v30 }
 0x30f   :  { %1879 = vtanh.f32 %v574_v27 }
 0x310   :  { %v1874_v31 = vpop.eup %1873 }
 0x311   :  { %v604_v32 = vadd.f32 1.0, %v1874_v31  ;;  %v1876_v33 = vpop.eup %1875 }
 0x313   :  { %1881 = vrcp.f32 %v604_v32 }
 0x31b   :  { %v1878_v34 = vpop.eup %1877 }
 0x31c   :  { %v2414_v36 = vsel %vm2344_vm6, %v1876_v33, %v1878_v34  ;;  %v1880_v37 = vpop.eup %1879  ;;  %v640_v45 = vpop.permute.xlu0 %639 }
 0x31d   :  { %643 = vrot.lane.b32.xlu0 %v2414_v36, %s2160_s29  ;;  %v655_v50 = vmul.f32 %v640_v45, %v2382_v63  ;;  %v627_v17 = vmul.f32 0.0, %v2414_v36 }
 0x320   :  { %v1882_v44 = vpop.eup %1881 }
 0x321   :  { %665 = vrot.lane.b32.xlu0 %v653_v38, %s2161_s30  ;;  %v2422_v48 = vsel %vm2344_vm6, %v1880_v37, %v1882_v44 }
 0x322   :  { %v638_v49 = vpop.permute.xlu1 %637  ;;  %645 = vrot.lane.b32.xlu1 %v2422_v48, %s2160_s29  ;;  %v628_v22 = vmul.f32 0.0, %v2422_v48 }
 0x323   :  { %v654_v51 = vmul.f32 %v638_v49, %v2388_v3 }
 0x325   :  { %669 = vrot.lane.b32.xlu0 %v655_v50, %s2161_s30 }
 0x326   :  { %v642_v52 = vpop.permute.xlu1 %641  ;;  %667 = vrot.lane.b32.xlu1 %v654_v51, %s2161_s30 }
 0x327   :  { %v656_v53 = vmul.f32 %v642_v52, %v2394_v6 }
 0x32a   :  { %671 = vrot.lane.b32.xlu1 %v656_v53, %s2161_s30 }
 0x38f   :  { %v644_v54 = vpop.permute.xlu0 %643 }
 0x390   :  { %v657_v55 = vmul.f32 %v644_v54, %v2414_v36 }
 0x392   :  { %673 = vrot.lane.b32.xlu0 %v657_v55, %s2161_s30 }
 0x393   :  { %v666_v59 = vpop.permute.xlu0 %665 }
 0x394   :  { %v2435_v61 = vadd.f32 %v666_v59, %v623_v58  ;;  %v646_v62 = vpop.permute.xlu1 %645 }
 0x395   :  { %v658_v1 = vmul.f32 %v646_v62, %v2422_v48 }
 0x396   :  { %1883 = vtanh.f32 %v2435_v61 }
 0x397   :  { %675 = vrot.lane.b32.xlu1 %v658_v1, %s2161_s30  ;;  %v670_v4 = vpop.permute.xlu0 %669 }
 0x398   :  { %v2442_v7 = vadd.f32 %v670_v4, %v625_v2  ;;  %v668_v8 = vpop.permute.xlu1 %667 }
 0x399   :  { %v2444_v9 = vadd.f32 %v668_v8, %v624_v5 }
 0x39a   :  { %1885 = vtanh.f32 %v2442_v7 }
 0x39b   :  { %1887 = vtanh.f32 %v2444_v9 }
 0x39c   :  { %v672_v11 = vpop.permute.xlu1 %671 }
 0x39d   :  { %v2449_v12 = vadd.f32 %v672_v11, %v626_v10 }
 0x39f   :  { %1889 = vtanh.f32 %v2449_v12 }
 0x3a3   :  { %v1884_v13 = vpop.eup %1883 }
 0x3a4   :  { %701 = vrot.lane.b32.xlu0 %v1884_v13, %s2162_s9 }
 0x3a7   :  { %v1886_v14 = vpop.eup %1885 }
 0x3a8   :  { %v1888_v15 = vpop.eup %1887  ;;  %705 = vrot.lane.b32.xlu0 %v1886_v14, %s2162_s9 }
 0x3a9   :  { %703 = vrot.lane.b32.xlu1 %v1888_v15, %s2162_s9 }
 0x3ac   :  { %v1890_v16 = vpop.eup %1889 }
 0x3ad   :  { %707 = vrot.lane.b32.xlu1 %v1890_v16, %s2162_s9 }
 0x404   :  { %v674_v19 = vpop.permute.xlu0 %673 }
 0x405   :  { %v2457_v21 = vadd.f32 %v674_v19, %v627_v17 }
 0x407   :  { %1891 = vtanh.f32 %v2457_v21 }
 0x409   :  { %v676_v24 = vpop.permute.xlu1 %675 }
 0x40a   :  { %v2461_v25 = vadd.f32 %v676_v24, %v628_v22 }
 0x40c   :  { %1893 = vtanh.f32 %v2461_v25 }
 0x414   :  { %v1892_v27 = vpop.eup %1891 }
 0x415   :  { %709 = vrot.lane.b32.xlu0 %v1892_v27, %s2162_s9 }
 0x416   :  { %v702_v28 = vpop.permute.xlu0 %701 }
 0x417   :  { %v719_v29 = vmul.f32 %v702_v28, %v2355_v20 }
 0x419   :  { %v1894_v30 = vpop.eup %1893  ;;  %737 = vrot.lane.b32.xlu0 %v719_v29, %s2163_s10 }
 0x41a   :  { %711 = vrot.lane.b32.xlu1 %v1894_v30, %s2162_s9  ;;  %v706_v31 = vpop.permute.xlu0 %705 }
 0x41b   :  { %v721_v32 = vmul.f32 %v706_v31, %v2382_v63  ;;  %v704_v33 = vpop.permute.xlu1 %703 }
 0x41c   :  { %v720_v34 = vmul.f32 %v704_v33, %v2388_v3 }
 0x41d   :  { %741 = vrot.lane.b32.xlu0 %v721_v32, %s2163_s10 }
 0x41e   :  { %739 = vrot.lane.b32.xlu1 %v720_v34, %s2163_s10 }
 0x41f   :  { %v708_v35 = vpop.permute.xlu1 %707 }
 0x420   :  { %v722_v37 = vmul.f32 %v708_v35, %v2394_v6 }
 0x422   :  { %743 = vrot.lane.b32.xlu1 %v722_v37, %s2163_s10 }
 0x487   :  { %v710_v20 = vpop.permute.xlu0 %709 }
 0x488   :  { %v723_v38 = vmul.f32 %v710_v20, %v2414_v36 }
 0x48a   :  { %745 = vrot.lane.b32.xlu0 %v723_v38, %s2163_s10 }
 0x48b   :  { %v738_v44 = vpop.permute.xlu0 %737 }
 0x48c   :  { %v712_v63 = vpop.permute.xlu1 %711  ;;  %1772 = vmatprep.mubr.msk.f32.mxu1 %vm470_vm7, %v738_v44 }
 0x48d   :  { %v724_v3 = vmul.f32 %v712_v63, %v2422_v48 }
 0x48e   :  { %293 = vrot.lane.b32.xlu0 %v2319_v0, %s2164_s11 }
 0x48f   :  { %747 = vrot.lane.b32.xlu1 %v724_v3, %s2163_s10  ;;  %v742_v45 = vpop.permute.xlu0 %741 }
 0x490   :  { %v740_v6 = vpop.permute.xlu1 %739 }
 0x491   :  { %1773 = vmatmul.mubr.msk.f32.vlgmr.msra.gmra.mxu1 %vm470_vm7, %v740_v6 }
 0x492   :  { %1775 = vmatprep.mubr.msk.f32.mxu1 %vm470_vm7, %v742_v45  ;;  %1795 = vmatpush3.msra.mxu1 %v2252_v40 }
 0x493   :  { %1796 = vmatprep.subr.mxu1 %v2254_v41 }
 0x494   :  { %v744_v36 = vpop.permute.xlu1 %743  ;;  %1797 = vmatpush3.msra.mxu1 %v2254_v41 }
 0x495   :  { %1776 = vmatmul.mubr.msk.f32.gmra.mxu1 %vm470_vm7, %v744_v36 }
 0x4fc   :  { %v746_v48 = vpop.permute.xlu0 %745 }
 0x4fd   :  { %1778 = vmatprep.mubr.msk.f32.mxu1 %vm470_vm7, %v746_v48 }
 0x500   :  { %v294_v49 = vpop.permute.xlu0 %293 }
 0x501   :  { %296 = vst.msk [vmem:[%s2885_s7 + $0x30] sm:$0xff] %vm279_vm2, %v294_v49  ;;  %v748_v50 = vpop.permute.xlu1 %747 }
 0x502   :  { %1779 = vmatmul.mubr.msk.f32.gmra.mxu1 %vm470_vm7, %v748_v50 }
 0x508   :  { %v311_v40 = vld [vmem:[%s2885_s7 + $0x30] sm:$0xff] }
 0x509   :  { %398 = vperm.xlu0 %1835, %v311_v40   ;;  %347 = vperm.xlu1 %1834, %v311_v40  }
 0x50d   :  { %1836 = vset.pattern.permute.xlu0 %v2156_v42  ;;  %1837 = vset.pattern.permute.xlu1 %v2157_v43 }
 0x551   :  { %v1774_v41 = vpop.f32.mrf.mxu1 }
 0x552   :  { %v857_v51 = vadd.f32 %v1774_v41, %v2371_v39 }
 0x553   :  { %v827_v52 = vpop.f32.mrf.mxu1 }
 0x554   :  { %v1674_v53 = vmul.f32 -1.442695, %v857_v51  ;;  %v856_v54 = vadd.f32 %v827_v52, %v2376_v47 }
 0x555   :  { %v1777_v55 = vpop.f32.mrf.mxu1 }
 0x556   :  { %1895 = vpow2.f32 %v1674_v53  ;;  %v1673_v58 = vmul.f32 -1.442695, %v856_v54  ;;  %v859_v59 = vadd.f32 %v1777_v55, %v2406_v23 }
 0x557   :  { %v837_v62 = vpop.f32.mrf.mxu1 }
 0x558   :  { %1897 = vpow2.f32 %v1673_v58  ;;  %v1676_v1 = vmul.f32 -1.442695, %v859_v59  ;;  %v858_v2 = vadd.f32 %v837_v62, %v2374_v46 }
 0x55a   :  { %1899 = vpow2.f32 %v1676_v1  ;;  %v1675_v42 = vmul.f32 -1.442695, %v858_v2 }
 0x55c   :  { %1901 = vpow2.f32 %v1675_v42 }
 0x55d   :  { %1903 = vtanh.f32 %v857_v51 }
 0x563   :  { %v1896_v4 = vpop.eup %1895 }
 0x564   :  { %v887_v5 = vadd.f32 1.0, %v1896_v4 }
 0x565   :  { %v1898_v8 = vpop.eup %1897 }
 0x566   :  { %1905 = vrcp.f32 %v887_v5  ;;  %v886_v10 = vadd.f32 1.0, %v1898_v8 }
 0x567   :  { %v1900_v47 = vpop.eup %1899  ;;  %1907 = vtanh.f32 %v856_v54 }
 0x568   :  { %1909 = vrcp.f32 %v886_v10  ;;  %v889_v11 = vadd.f32 1.0, %v1900_v47 }
 0x569   :  { %v1902_v13 = vpop.eup %1901  ;;  %1911 = vtanh.f32 %v859_v59 }
 0x56a   :  { %1913 = vrcp.f32 %v889_v11  ;;  %v888_v14 = vadd.f32 1.0, %v1902_v13  ;;  %v1904_v15 = vpop.eup %1903 }
 0x56b   :  { %1915 = vtanh.f32 %v858_v2 }
 0x56c   :  { %1917 = vrcp.f32 %v888_v14 }
 0x573   :  { %v1906_v16 = vpop.eup %1905 }
 0x574   :  { %v1908_v17 = vpop.eup %1907  ;;  %v2503_v19 = vsel %vm2344_vm6, %v1904_v15, %v1906_v16 }
 0x575   :  { %v1910_v22 = vpop.eup %1909  ;;  %924 = vrot.lane.b32.xlu0 %v2503_v19, %s2160_s29  ;;  %v911_v14 = vmul.f32 %v2503_v19, %v2444_v9 }
 0x576   :  { %v1912_v24 = vpop.eup %1911  ;;  %v2509_v27 = vsel %vm2344_vm6, %v1908_v17, %v1910_v22 }
 0x577   :  { %v1914_v28 = vpop.eup %1913  ;;  %922 = vrot.lane.b32.xlu1 %v2509_v27, %s2160_s29  ;;  %v910_v17 = vmul.f32 %v2509_v27, %v2435_v61 }
 0x578   :  { %v1916_v29 = vpop.eup %1915  ;;  %v2515_v30 = vsel %vm2344_vm6, %v1912_v24, %v1914_v28 }
 0x579   :  { %v1918_v31 = vpop.eup %1917  ;;  %928 = vrot.lane.b32.xlu0 %v2515_v30, %s2160_s29  ;;  %v913_v28 = vmul.f32 %v2515_v30, %v2449_v12 }
 0x57a   :  { %v2521_v32 = vsel %vm2344_vm6, %v1916_v29, %v1918_v31 }
 0x57b   :  { %926 = vrot.lane.b32.xlu1 %v2521_v32, %s2160_s29  ;;  %v912_v31 = vmul.f32 %v2521_v32, %v2442_v7 }
 0x584   :  { %v399_v33 = vpop.permute.xlu0 %398  ;;  %v348_v34 = vpop.permute.xlu1 %347 }
 0x585   :  { %v419_v35 = vmul.f32 %v2308_v57, %v399_v33  ;;  %v370_v37 = vmul.f32 %v2306_v56, %v348_v34 }
 0x587   :  { %v428_v20 = vadd.f32 %v419_v35, %v370_v37 }
 0x589   :  { %v444_v38 = vadd.f32 %v2315_v60, %v428_v20 }
 0x58b   :  { %454 = vst.msk [vmem:[#allocation2 + $0x30] sm:$0xff] %vm447_vm3, %v444_v38 }
 0x592   :  { %v2529_v44 = vld [vmem:[#allocation2 + $0x30] sm:$0xff] }
 0x5c2   :  { %v1780_v63 = vpop.f32.mrf.mxu1 }
 0x5c3   :  { %v861_v3 = vadd.f32 %v1780_v63, %v2529_v44 }
 0x5c4   :  { %v847_v6 = vpop.f32.mrf.mxu1 }
 0x5c5   :  { %v1678_v45 = vmul.f32 -1.442695, %v861_v3  ;;  %v860_v36 = vadd.f32 %v847_v6, %v2409_v26 }
 0x5c7   :  { %1919 = vpow2.f32 %v1678_v45  ;;  %v1677_v48 = vmul.f32 -1.442695, %v860_v36 }
 0x5c9   :  { %1921 = vpow2.f32 %v1677_v48 }
 0x5ca   :  { %1923 = vtanh.f32 %v861_v3 }
 0x5d4   :  { %v1920_v49 = vpop.eup %1919 }
 0x5d5   :  { %v891_v50 = vadd.f32 1.0, %v1920_v49 }
 0x5d6   :  { %v1922_v40 = vpop.eup %1921 }
 0x5d7   :  { %1925 = vrcp.f32 %v891_v50  ;;  %v890_v41 = vadd.f32 1.0, %v1922_v40  ;;  %v1924_v51 = vpop.eup %1923 }
 0x5d8   :  { %1927 = vtanh.f32 %v860_v36 }
 0x5d9   :  { %1929 = vrcp.f32 %v890_v41 }
 0x5e4   :  { %v1926_v52 = vpop.eup %1925 }
 0x5e5   :  { %v1928_v53 = vpop.eup %1927  ;;  %v2535_v54 = vsel %vm2344_vm6, %v1924_v51, %v1926_v52 }
 0x5e6   :  { %v1930_v55 = vpop.eup %1929  ;;  %932 = vrot.lane.b32.xlu0 %v2535_v54, %s2160_s29  ;;  %v915_v7 = vmul.f32 %v2535_v54, %v2461_v25 }
 0x5e7   :  { %v925_v58 = vpop.permute.xlu0 %924  ;;  %v2541_v59 = vsel %vm2344_vm6, %v1928_v53, %v1930_v55 }
 0x5e8   :  { %v941_v62 = vmul.f32 %v925_v58, %v2503_v19  ;;  %930 = vrot.lane.b32.xlu1 %v2541_v59, %s2160_s29  ;;  %v914_v63 = vmul.f32 %v2541_v59, %v2457_v21 }
 0x5e9   :  { %v923_v1 = vpop.permute.xlu1 %922 }
 0x5ea   :  { %v940_v2 = vmul.f32 %v923_v1, %v2509_v27  ;;  %954 = vrot.lane.b32.xlu0 %v941_v62, %s2161_s30 }
 0x5eb   :  { %v929_v42 = vpop.permute.xlu0 %928 }
 0x5ec   :  { %v943_v4 = vmul.f32 %v929_v42, %v2515_v30  ;;  %952 = vrot.lane.b32.xlu1 %v940_v2, %s2161_s30 }
 0x5ed   :  { %v927_v5 = vpop.permute.xlu1 %926 }
 0x5ee   :  { %v942_v8 = vmul.f32 %v927_v5, %v2521_v32  ;;  %958 = vrot.lane.b32.xlu0 %v943_v4, %s2161_s30 }
 0x5f0   :  { %956 = vrot.lane.b32.xlu1 %v942_v8, %s2161_s30 }
 0x658   :  { %v933_v10 = vpop.permute.xlu0 %932 }
 0x659   :  { %v945_v47 = vmul.f32 %v933_v10, %v2535_v54 }
 0x65a   :  { %v931_v11 = vpop.permute.xlu1 %930 }
 0x65b   :  { %v944_v13 = vmul.f32 %v931_v11, %v2541_v59  ;;  %962 = vrot.lane.b32.xlu0 %v945_v47, %s2161_s30 }
 0x65c   :  { %v955_v15 = vpop.permute.xlu0 %954 }
 0x65d   :  { %v2558_v16 = vadd.f32 %v955_v15, %v911_v14  ;;  %960 = vrot.lane.b32.xlu1 %v944_v13, %s2161_s30 }
 0x65e   :  { %v953_v22 = vpop.permute.xlu1 %952 }
 0x65f   :  { %1931 = vtanh.f32 %v2558_v16  ;;  %v2564_v24 = vadd.f32 %v953_v22, %v910_v17 }
 0x660   :  { %v959_v29 = vpop.permute.xlu0 %958 }
 0x661   :  { %1933 = vtanh.f32 %v2564_v24  ;;  %v2569_v9 = vadd.f32 %v959_v29, %v913_v28 }
 0x662   :  { %v957_v33 = vpop.permute.xlu1 %956 }
 0x663   :  { %1935 = vtanh.f32 %v2569_v9  ;;  %v2574_v61 = vadd.f32 %v957_v33, %v912_v31 }
 0x665   :  { %1937 = vtanh.f32 %v2574_v61 }
 0x66c   :  { %v1932_v34 = vpop.eup %1931 }
 0x66d   :  { %990 = vrot.lane.b32.xlu0 %v1932_v34, %s2162_s9 }
 0x66e   :  { %v1934_v35 = vpop.eup %1933 }
 0x66f   :  { %988 = vrot.lane.b32.xlu1 %v1934_v35, %s2162_s9 }
 0x670   :  { %v1936_v12 = vpop.eup %1935 }
 0x671   :  { %994 = vrot.lane.b32.xlu0 %v1936_v12, %s2162_s9 }
 0x672   :  { %v1938_v37 = vpop.eup %1937 }
 0x673   :  { %992 = vrot.lane.b32.xlu1 %v1938_v37, %s2162_s9 }
 0x6cd   :  { %v963_v20 = vpop.permute.xlu0 %962 }
 0x6ce   :  { %v2583_v38 = vadd.f32 %v963_v20, %v915_v7 }
 0x6cf   :  { %v961_v3 = vpop.permute.xlu1 %960 }
 0x6d0   :  { %1939 = vtanh.f32 %v2583_v38  ;;  %v2588_v6 = vadd.f32 %v961_v3, %v914_v63 }
 0x6d2   :  { %1941 = vtanh.f32 %v2588_v6 }
 0x6dd   :  { %v1940_v45 = vpop.eup %1939 }
 0x6de   :  { %998 = vrot.lane.b32.xlu0 %v1940_v45, %s2162_s9 }
 0x6df   :  { %v1942_v36 = vpop.eup %1941  ;;  %v991_v48 = vpop.permute.xlu0 %990 }
 0x6e0   :  { %v1007_v25 = vmul.f32 %v991_v48, %v2503_v19  ;;  %996 = vrot.lane.b32.xlu1 %v1942_v36, %s2162_s9 }
 0x6e1   :  { %v989_v49 = vpop.permute.xlu1 %988 }
 0x6e2   :  { %v1006_v50 = vmul.f32 %v989_v49, %v2509_v27  ;;  %1026 = vrot.lane.b32.xlu0 %v1007_v25, %s2163_s10 }
 0x6e3   :  { %v995_v21 = vpop.permute.xlu0 %994 }
 0x6e4   :  { %v1009_v40 = vmul.f32 %v995_v21, %v2515_v30  ;;  %1024 = vrot.lane.b32.xlu1 %v1006_v50, %s2163_s10 }
 0x6e5   :  { %v993_v41 = vpop.permute.xlu1 %992 }
 0x6e6   :  { %v1008_v51 = vmul.f32 %v993_v41, %v2521_v32  ;;  %1030 = vrot.lane.b32.xlu0 %v1009_v40, %s2163_s10 }
 0x6e8   :  { %1028 = vrot.lane.b32.xlu1 %v1008_v51, %s2163_s10 }
 0x750   :  { %v999_v19 = vpop.permute.xlu0 %998 }
 0x751   :  { %v1011_v52 = vmul.f32 %v999_v19, %v2535_v54 }
 0x752   :  { %v997_v53 = vpop.permute.xlu1 %996 }
 0x753   :  { %v1010_v27 = vmul.f32 %v997_v53, %v2541_v59  ;;  %1034 = vrot.lane.b32.xlu0 %v1011_v52, %s2163_s10 }
 0x754   :  { %v1027_v55 = vpop.permute.xlu0 %1026 }
 0x755   :  { %1032 = vrot.lane.b32.xlu1 %v1010_v27, %s2163_s10 }
 0x756   :  { %v1025_v30 = vpop.permute.xlu1 %1024 }
 0x757   :  { %1785 = vmatprep.mubr.msk.f32.mxu0 %vm470_vm7, %v1025_v30 }
 0x758   :  { %1786 = vmatmul.mubr.msk.f32.vlgmr.msra.gmra.mxu0 %vm470_vm7, %v1027_v55  ;;  %v1031_v58 = vpop.permute.xlu0 %1030 }
 0x759   :  { %297 = vrot.lane.b32.xlu1 %v2319_v0, %s2165_s16 }
 0x75a   :  { %v1029_v32 = vpop.permute.xlu1 %1028 }
 0x75b   :  { %1788 = vmatprep.mubr.msk.f32.mxu0 %vm470_vm7, %v1029_v32 }
 0x75c   :  { %1789 = vmatmul.mubr.msk.f32.gmra.mxu0 %vm470_vm7, %v1031_v58 }
 0x7c5   :  { %v1035_v59 = vpop.permute.xlu0 %1034 }
 0x7c7   :  { %v1033_v54 = vpop.permute.xlu1 %1032 }
 0x7c8   :  { %1791 = vmatprep.mubr.msk.f32.mxu0 %vm470_vm7, %v1033_v54 }
 0x7c9   :  { %1792 = vmatmul.mubr.msk.f32.gmra.mxu0 %vm470_vm7, %v1035_v59 }
 0x7cb   :  { %v298_v62 = vpop.permute.xlu1 %297 }
 0x7cc   :  { %300 = vst.msk [vmem:[%s2885_s7 + $0x38] sm:$0xff] %vm279_vm2, %v298_v62 }
 0x7d3   :  { %v312_v1 = vld [vmem:[%s2885_s7 + $0x38] sm:$0xff] }
 0x7d4   :  { %402 = vperm.xlu1 %1837, %v312_v1   ;;  %352 = vperm.xlu0 %1836, %v312_v1  }
 0x818   :  { %v1787_v2 = vpop.f32.mrf.mxu0 }
 0x819   :  { %v1144_v42 = vadd.f32 %v1787_v2, %v2374_v46 }
 0x81a   :  { %v1114_v4 = vpop.f32.mrf.mxu0 }
 0x81b   :  { %v1686_v5 = vmul.f32 -1.442695, %v1144_v42  ;;  %v1143_v8 = vadd.f32 %v1114_v4, %v2371_v39 }
 0x81c   :  { %v1790_v10 = vpop.f32.mrf.mxu0 }
 0x81d   :  { %1943 = vpow2.f32 %v1686_v5  ;;  %v1685_v47 = vmul.f32 -1.442695, %v1143_v8  ;;  %v1146_v11 = vadd.f32 %v1790_v10, %v2409_v26 }
 0x81e   :  { %v1124_v13 = vpop.f32.mrf.mxu0 }
 0x81f   :  { %1945 = vpow2.f32 %v1685_v47  ;;  %v1688_v14 = vmul.f32 -1.442695, %v1146_v11  ;;  %v1145_v15 = vadd.f32 %v1124_v13, %v2406_v23 }
 0x821   :  { %1947 = vpow2.f32 %v1688_v14  ;;  %v1687_v17 = vmul.f32 -1.442695, %v1145_v15 }
 0x823   :  { %1949 = vpow2.f32 %v1687_v17 }
 0x824   :  { %1951 = vtanh.f32 %v1144_v42 }
 0x82a   :  { %v1944_v22 = vpop.eup %1943 }
 0x82b   :  { %v1174_v28 = vadd.f32 1.0, %v1944_v22 }
 0x82c   :  { %v1946_v46 = vpop.eup %1945 }
 0x82d   :  { %1953 = vrcp.f32 %v1174_v28  ;;  %v1173_v29 = vadd.f32 1.0, %v1946_v46 }
 0x82e   :  { %v1948_v39 = vpop.eup %1947  ;;  %1955 = vtanh.f32 %v1143_v8 }
 0x82f   :  { %1957 = vrcp.f32 %v1173_v29  ;;  %v1176_v31 = vadd.f32 1.0, %v1948_v39 }
 0x830   :  { %v1950_v33 = vpop.eup %1949  ;;  %1959 = vtanh.f32 %v1146_v11 }
 0x831   :  { %1961 = vrcp.f32 %v1176_v31  ;;  %v1175_v34 = vadd.f32 1.0, %v1950_v33  ;;  %v1952_v35 = vpop.eup %1951 }
 0x832   :  { %1963 = vtanh.f32 %v1145_v15 }
 0x833   :  { %1965 = vrcp.f32 %v1175_v34 }
 0x83a   :  { %v1954_v12 = vpop.eup %1953 }
 0x83b   :  { %v1956_v37 = vpop.eup %1955  ;;  %v2625_v7 = vsel %vm2344_vm6, %v1952_v35, %v1954_v12 }
 0x83c   :  { %v1958_v20 = vpop.eup %1957  ;;  %1211 = vrot.lane.b32.xlu0 %v2625_v7, %s2160_s29  ;;  %v1198_v31 = vmul.f32 %v2625_v7, %v2558_v16 }
 0x83d   :  { %v1960_v63 = vpop.eup %1959  ;;  %v2631_v3 = vsel %vm2344_vm6, %v1956_v37, %v1958_v20 }
 0x83e   :  { %v1962_v45 = vpop.eup %1961  ;;  %1209 = vrot.lane.b32.xlu1 %v2631_v3, %s2160_s29  ;;  %v1197_v35 = vmul.f32 %v2631_v3, %v2564_v24 }
 0x83f   :  { %v1964_v36 = vpop.eup %1963  ;;  %v2637_v48 = vsel %vm2344_vm6, %v1960_v63, %v1962_v45 }
 0x840   :  { %v1966_v25 = vpop.eup %1965  ;;  %1215 = vrot.lane.b32.xlu0 %v2637_v48, %s2160_s29  ;;  %v1200_v20 = vmul.f32 %v2637_v48, %v2569_v9 }
 0x841   :  { %v2643_v49 = vsel %vm2344_vm6, %v1964_v36, %v1966_v25 }
 0x842   :  { %1213 = vrot.lane.b32.xlu1 %v2643_v49, %s2160_s29  ;;  %v1199_v45 = vmul.f32 %v2643_v49, %v2574_v61 }
 0x84f   :  { %v403_v50 = vpop.permute.xlu1 %402  ;;  %v353_v21 = vpop.permute.xlu0 %352 }
 0x850   :  { %v420_v40 = vmul.f32 %v2308_v57, %v403_v50  ;;  %v371_v41 = vmul.f32 %v2306_v56, %v353_v21 }
 0x852   :  { %v429_v51 = vadd.f32 %v420_v40, %v371_v41 }
 0x854   :  { %v445_v19 = vadd.f32 %v2315_v60, %v429_v51 }
 0x856   :  { %455 = vst.msk [vmem:[#allocation2 + $0x38] sm:$0xff] %vm447_vm3, %v445_v19 }
 0x85d   :  { %v2651_v52 = vld [vmem:[#allocation2 + $0x38] sm:$0xff] }
 0x889   :  { %v1793_v53 = vpop.f32.mrf.mxu0 }
 0x88a   :  { %v1148_v27 = vadd.f32 %v1793_v53, %v2651_v52 }
 0x88b   :  { %v1134_v55 = vpop.f32.mrf.mxu0 }
 0x88c   :  { %v1690_v30 = vmul.f32 -1.442695, %v1148_v27  ;;  %v1147_v32 = vadd.f32 %v1134_v55, %v2529_v44 }
 0x88e   :  { %1967 = vpow2.f32 %v1690_v30  ;;  %v1689_v58 = vmul.f32 -1.442695, %v1147_v32 }
 0x890   :  { %1969 = vpow2.f32 %v1689_v58 }
 0x891   :  { %1971 = vtanh.f32 %v1148_v27 }
 0x89b   :  { %v1968_v54 = vpop.eup %1967 }
 0x89c   :  { %v1178_v59 = vadd.f32 1.0, %v1968_v54 }
 0x89d   :  { %v1970_v62 = vpop.eup %1969 }
 0x89e   :  { %1973 = vrcp.f32 %v1178_v59  ;;  %v1177_v60 = vadd.f32 1.0, %v1970_v62  ;;  %v1972_v1 = vpop.eup %1971 }
 0x89f   :  { %1975 = vtanh.f32 %v1147_v32 }
 0x8a0   :  { %1977 = vrcp.f32 %v1177_v60 }
 0x8ab   :  { %v1974_v2 = vpop.eup %1973 }
 0x8ac   :  { %v1976_v42 = vpop.eup %1975  ;;  %v2657_v4 = vsel %vm2344_vm6, %v1972_v1, %v1974_v2 }
 0x8ad   :  { %v1978_v5 = vpop.eup %1977  ;;  %1219 = vrot.lane.b32.xlu0 %v2657_v4, %s2160_s29  ;;  %v1202_v61 = vmul.f32 %v2657_v4, %v2583_v38 }
 0x8ae   :  { %v1212_v8 = vpop.permute.xlu0 %1211  ;;  %v2663_v10 = vsel %vm2344_vm6, %v1976_v42, %v1978_v5 }
 0x8af   :  { %v1228_v47 = vmul.f32 %v1212_v8, %v2625_v7  ;;  %1217 = vrot.lane.b32.xlu1 %v2663_v10, %s2160_s29  ;;  %v1201_v51 = vmul.f32 %v2663_v10, %v2588_v6 }
 0x8b0   :  { %v1210_v11 = vpop.permute.xlu1 %1209 }
 0x8b1   :  { %v1227_v13 = vmul.f32 %v1210_v11, %v2631_v3  ;;  %1241 = vrot.lane.b32.xlu0 %v1228_v47, %s2161_s30 }
 0x8b2   :  { %v1216_v14 = vpop.permute.xlu0 %1215 }
 0x8b3   :  { %v1230_v15 = vmul.f32 %v1216_v14, %v2637_v48  ;;  %1239 = vrot.lane.b32.xlu1 %v1227_v13, %s2161_s30  ;;  %v2039_v14 = vld [vmem:[#allocation2 + $0x18] sm:$0xff] }
 0x8b4   :  { %v1214_v17 = vpop.permute.xlu1 %1213 }
 0x8b5   :  { %v1229_v22 = vmul.f32 %v1214_v17, %v2643_v49  ;;  %1245 = vrot.lane.b32.xlu0 %v1230_v15, %s2161_s30 }
 0x8b7   :  { %1243 = vrot.lane.b32.xlu1 %v1229_v22, %s2161_s30 }
 0x91f   :  { %v1220_v28 = vpop.permute.xlu0 %1219 }
 0x920   :  { %v1232_v46 = vmul.f32 %v1220_v28, %v2657_v4 }
 0x921   :  { %v1218_v29 = vpop.permute.xlu1 %1217 }
 0x922   :  { %v1231_v39 = vmul.f32 %v1218_v29, %v2663_v10  ;;  %1249 = vrot.lane.b32.xlu0 %v1232_v46, %s2161_s30 }
 0x923   :  { %v1242_v33 = vpop.permute.xlu0 %1241 }
 0x924   :  { %v2680_v34 = vadd.f32 %v1242_v33, %v1198_v31  ;;  %1247 = vrot.lane.b32.xlu1 %v1231_v39, %s2161_s30 }
 0x925   :  { %v1240_v12 = vpop.permute.xlu1 %1239 }
 0x926   :  { %1979 = vtanh.f32 %v2680_v34  ;;  %v2686_v37 = vadd.f32 %v1240_v12, %v1197_v35 }
 0x927   :  { %v1246_v63 = vpop.permute.xlu0 %1245 }
 0x928   :  { %1981 = vtanh.f32 %v2686_v37  ;;  %v2691_v16 = vadd.f32 %v1246_v63, %v1200_v20 }
 0x929   :  { %v1244_v36 = vpop.permute.xlu1 %1243 }
 0x92a   :  { %1983 = vtanh.f32 %v2691_v16  ;;  %v2696_v24 = vadd.f32 %v1244_v36, %v1199_v45 }
 0x92c   :  { %1985 = vtanh.f32 %v2696_v24 }
 0x933   :  { %v1980_v25 = vpop.eup %1979 }
 0x934   :  { %1277 = vrot.lane.b32.xlu0 %v1980_v25, %s2162_s9 }
 0x935   :  { %v1982_v50 = vpop.eup %1981 }
 0x936   :  { %1275 = vrot.lane.b32.xlu1 %v1982_v50, %s2162_s9 }
 0x937   :  { %v1984_v9 = vpop.eup %1983 }
 0x938   :  { %1281 = vrot.lane.b32.xlu0 %v1984_v9, %s2162_s9 }
 0x939   :  { %v1986_v21 = vpop.eup %1985 }
 0x93a   :  { %1279 = vrot.lane.b32.xlu1 %v1986_v21, %s2162_s9 }
 0x994   :  { %v1250_v40 = vpop.permute.xlu0 %1249 }
 0x995   :  { %v2705_v41 = vadd.f32 %v1250_v40, %v1202_v61 }
 0x996   :  { %v1248_v19 = vpop.permute.xlu1 %1247 }
 0x997   :  { %1987 = vtanh.f32 %v2705_v41  ;;  %v2710_v53 = vadd.f32 %v1248_v19, %v1201_v51 }
 0x999   :  { %1989 = vtanh.f32 %v2710_v53 }
 0x9a4   :  { %v1988_v27 = vpop.eup %1987 }
 0x9a5   :  { %1285 = vrot.lane.b32.xlu0 %v1988_v27, %s2162_s9 }
 0x9a6   :  { %v1990_v55 = vpop.eup %1989  ;;  %v1278_v30 = vpop.permute.xlu0 %1277 }
 0x9a7   :  { %v1294_v38 = vmul.f32 %v1278_v30, %v2625_v7  ;;  %1283 = vrot.lane.b32.xlu1 %v1990_v55, %s2162_s9 }
 0x9a8   :  { %v1276_v32 = vpop.permute.xlu1 %1275 }
 0x9a9   :  { %v1293_v58 = vmul.f32 %v1276_v32, %v2631_v3  ;;  %1313 = vrot.lane.b32.xlu0 %v1294_v38, %s2163_s10 }
 0x9aa   :  { %v1282_v6 = vpop.permute.xlu0 %1281 }
 0x9ab   :  { %v1296_v54 = vmul.f32 %v1282_v6, %v2637_v48  ;;  %1311 = vrot.lane.b32.xlu1 %v1293_v58, %s2163_s10  ;;  %v2040_v6 = vld [vmem:[%s2884_s6] ss:$0 sm:$0xff]  ;;  %s2167_s6 = smov 112  }
 0x9ac   :  { %v1280_v59 = vpop.permute.xlu1 %1279 }
 0x9ad   :  { %v1295_v62 = vmul.f32 %v1280_v59, %v2643_v49  ;;  %1317 = vrot.lane.b32.xlu0 %v1296_v54, %s2163_s10 }
 0x9af   :  { %1315 = vrot.lane.b32.xlu1 %v1295_v62, %s2163_s10 }
 0xa17   :  { %v1286_v7 = vpop.permute.xlu0 %1285 }
 0xa18   :  { %v1298_v60 = vmul.f32 %v1286_v7, %v2657_v4 }
 0xa19   :  { %v1284_v1 = vpop.permute.xlu1 %1283 }
 0xa1a   :  { %v1297_v3 = vmul.f32 %v1284_v1, %v2663_v10  ;;  %1321 = vrot.lane.b32.xlu0 %v1298_v60, %s2163_s10 }
 0xa1b   :  { %v1314_v2 = vpop.permute.xlu0 %1313 }
 0xa1c   :  { %1319 = vrot.lane.b32.xlu1 %v1297_v3, %s2163_s10 }
 0xa1d   :  { %v1312_v48 = vpop.permute.xlu1 %1311 }
 0xa1e   :  { %1798 = vmatprep.mubr.msk.f32.mxu1 %vm470_vm7, %v1312_v48 }
 0xa1f   :  { %1799 = vmatmul.mubr.msk.f32.vlgmr.msra.gmra.mxu1 %vm470_vm7, %v1314_v2  ;;  %v1318_v42 = vpop.permute.xlu0 %1317 }
 0xa20   :  { %301 = vrot.lane.b32.xlu1 %v2319_v0, %s2166_s4 }
 0xa21   :  { %v1316_v49 = vpop.permute.xlu1 %1315 }
 0xa22   :  { %1801 = vmatprep.mubr.msk.f32.mxu1 %vm470_vm7, %v1316_v49 }
 0xa23   :  { %1802 = vmatmul.mubr.msk.f32.gmra.mxu1 %vm470_vm7, %v1318_v42 }
 0xa8c   :  { %v1322_v5 = vpop.permute.xlu0 %1321 }
 0xa8e   :  { %v1320_v4 = vpop.permute.xlu1 %1319 }
 0xa8f   :  { %1804 = vmatprep.mubr.msk.f32.mxu1 %vm470_vm7, %v1320_v4 }
 0xa90   :  { %1805 = vmatmul.mubr.msk.f32.gmra.mxu1 %vm470_vm7, %v1322_v5 }
 0xa92   :  { %v302_v8 = vpop.permute.xlu1 %301 }
 0xa93   :  { %304 = vst.msk [vmem:[%s2885_s7 + $0x40] sm:$0xff] %vm279_vm2, %v302_v8 }
 0xa9a   :  { %v313_v0 = vld [vmem:[%s2885_s7 + $0x40] sm:$0xff] }
 0xa9b   :  { %406 = vperm.xlu1 %1837, %v313_v0   ;;  %357 = vperm.xlu0 %1836, %v313_v0  }
 0xa9f   :  { %1838 = vset.pattern.permute.xlu0 %v2157_v43 }
 0xadf   :  { %v1800_v10 = vpop.f32.mrf.mxu1 }
 0xae0   :  { %v1431_v47 = vadd.f32 %v1800_v10, %v2406_v23 }
 0xae1   :  { %v1401_v11 = vpop.f32.mrf.mxu1 }
 0xae2   :  { %v1698_v13 = vmul.f32 -1.442695, %v1431_v47  ;;  %v1430_v15 = vadd.f32 %v2039_v14, %v1401_v11 }
 0xae3   :  { %v1803_v17 = vpop.f32.mrf.mxu1 }
 0xae4   :  { %1991 = vpow2.f32 %v1698_v13  ;;  %v1697_v22 = vmul.f32 -1.442695, %v1430_v15  ;;  %v1433_v28 = vadd.f32 %v1803_v17, %v2529_v44 }
 0xae5   :  { %v1411_v46 = vpop.f32.mrf.mxu1 }
 0xae6   :  { %1993 = vpow2.f32 %v1697_v22  ;;  %v1700_v29 = vmul.f32 -1.442695, %v1433_v28  ;;  %v1432_v39 = vadd.f32 %v1411_v46, %v2409_v26 }
 0xae8   :  { %1995 = vpow2.f32 %v1700_v29  ;;  %v1699_v31 = vmul.f32 -1.442695, %v1432_v39 }
 0xaea   :  { %1997 = vpow2.f32 %v1699_v31 }
 0xaeb   :  { %1999 = vtanh.f32 %v1431_v47 }
 0xaf1   :  { %v1992_v43 = vpop.eup %1991 }
 0xaf2   :  { %v1461_v33 = vadd.f32 1.0, %v1992_v43 }
 0xaf3   :  { %v1994_v23 = vpop.eup %1993 }
 0xaf4   :  { %2001 = vrcp.f32 %v1461_v33  ;;  %v1460_v35 = vadd.f32 1.0, %v1994_v23 }
 0xaf5   :  { %v1996_v12 = vpop.eup %1995  ;;  %2003 = vtanh.f32 %v1430_v15 }
 0xaf6   :  { %2005 = vrcp.f32 %v1460_v35  ;;  %v1463_v20 = vadd.f32 1.0, %v1996_v12 }
 0xaf7   :  { %v1998_v63 = vpop.eup %1997  ;;  %2007 = vtanh.f32 %v1433_v28 }
 0xaf8   :  { %2009 = vrcp.f32 %v1463_v20  ;;  %v1462_v44 = vadd.f32 1.0, %v1998_v63  ;;  %v2000_v26 = vpop.eup %1999 }
 0xaf9   :  { %2011 = vtanh.f32 %v1432_v39 }
 0xafa   :  { %2013 = vrcp.f32 %v1462_v44 }
 0xb01   :  { %v2002_v45 = vpop.eup %2001 }
 0xb02   :  { %v2004_v36 = vpop.eup %2003  ;;  %v2747_v25 = vsel %vm2344_vm6, %v2000_v26, %v2002_v45 }
 0xb03   :  { %v2006_v50 = vpop.eup %2005  ;;  %1498 = vrot.lane.b32.xlu1 %v2747_v25, %s2160_s29  ;;  %v1485_v39 = vmul.f32 %v2747_v25, %v2680_v34 }
 0xb04   :  { %v2008_v9 = vpop.eup %2007  ;;  %v2753_v21 = vsel %vm2344_vm6, %v2004_v36, %v2006_v50 }
 0xb05   :  { %v2010_v61 = vpop.eup %2009  ;;  %1496 = vrot.lane.b32.xlu0 %v2753_v21, %s2160_s29  ;;  %v1484_v33 = vmul.f32 %v2753_v21, %v2686_v37 }
 0xb06   :  { %v2012_v40 = vpop.eup %2011  ;;  %v2759_v51 = vsel %vm2344_vm6, %v2008_v9, %v2010_v61 }
 0xb07   :  { %v2014_v19 = vpop.eup %2013  ;;  %1502 = vrot.lane.b32.xlu1 %v2759_v51, %s2160_s29  ;;  %v1487_v12 = vmul.f32 %v2759_v51, %v2691_v16 }
 0xb08   :  { %v2765_v27 = vsel %vm2344_vm6, %v2012_v40, %v2014_v19 }
 0xb09   :  { %1500 = vrot.lane.b32.xlu0 %v2765_v27, %s2160_s29  ;;  %v1486_v44 = vmul.f32 %v2765_v27, %v2696_v24 }
 0xb16   :  { %v407_v55 = vpop.permute.xlu1 %406  ;;  %v358_v30 = vpop.permute.xlu0 %357 }
 0xb17   :  { %v421_v38 = vmul.f32 %v2308_v57, %v407_v55  ;;  %v372_v32 = vmul.f32 %v2306_v56, %v358_v30 }
 0xb19   :  { %v430_v58 = vadd.f32 %v421_v38, %v372_v32 }
 0xb1b   :  { %v446_v54 = vadd.f32 %v2040_v6, %v430_v58 }
 0xb1d   :  { %456 = vst.msk [vmem:[#allocation2 + $0x40] sm:$0xff] %vm447_vm3, %v446_v54 }
 0xb24   :  { %v1304_v59 = vld [vmem:[#allocation2 + $0x40] sm:$0xff] }
 0xb50   :  { %v1806_v62 = vpop.f32.mrf.mxu1 }
 0xb51   :  { %v1435_v7 = vadd.f32 %v1806_v62, %v1304_v59 }
 0xb52   :  { %v1421_v60 = vpop.f32.mrf.mxu1 }
 0xb53   :  { %v1702_v1 = vmul.f32 -1.442695, %v1435_v7  ;;  %v1434_v3 = vadd.f32 %v1421_v60, %v2651_v52 }
 0xb55   :  { %2015 = vpow2.f32 %v1702_v1  ;;  %v1701_v2 = vmul.f32 -1.442695, %v1434_v3 }
 0xb57   :  { %2017 = vpow2.f32 %v1701_v2 }
 0xb58   :  { %2019 = vtanh.f32 %v1435_v7 }
 0xb62   :  { %v2016_v57 = vpop.eup %2015 }
 0xb63   :  { %v1465_v56 = vadd.f32 1.0, %v2016_v57 }
 0xb64   :  { %v2018_v48 = vpop.eup %2017 }
 0xb65   :  { %2021 = vrcp.f32 %v1465_v56  ;;  %v1464_v49 = vadd.f32 1.0, %v2018_v48  ;;  %v2020_v42 = vpop.eup %2019 }
 0xb66   :  { %2023 = vtanh.f32 %v1434_v3 }
 0xb67   :  { %2025 = vrcp.f32 %v1464_v49 }
 0xb72   :  { %v2022_v4 = vpop.eup %2021 }
 0xb73   :  { %v2024_v5 = vpop.eup %2023  ;;  %v2778_v8 = vsel %vm2344_vm6, %v2020_v42, %v2022_v4 }
 0xb74   :  { %v2026_v0 = vpop.eup %2025  ;;  %1506 = vrot.lane.b32.xlu1 %v2778_v8, %s2160_s29  ;;  %v1489_v50 = vmul.f32 %v2778_v8, %v2705_v41 }
 0xb75   :  { %v1499_v52 = vpop.permute.xlu1 %1498  ;;  %v2784_v10 = vsel %vm2344_vm6, %v2024_v5, %v2026_v0 }
 0xb76   :  { %v1515_v47 = vmul.f32 %v1499_v52, %v2747_v25  ;;  %1504 = vrot.lane.b32.xlu0 %v2784_v10, %s2160_s29  ;;  %v1488_v61 = vmul.f32 %v2784_v10, %v2710_v53 }
 0xb77   :  { %v1497_v11 = vpop.permute.xlu0 %1496 }
 0xb78   :  { %v1514_v13 = vmul.f32 %v1497_v11, %v2753_v21  ;;  %1528 = vrot.lane.b32.xlu1 %v1515_v47, %s2161_s30 }
 0xb79   :  { %v1503_v14 = vpop.permute.xlu1 %1502 }
 0xb7a   :  { %v1517_v15 = vmul.f32 %v1503_v14, %v2759_v51  ;;  %1526 = vrot.lane.b32.xlu0 %v1514_v13, %s2161_s30 }
 0xb7b   :  { %v1501_v17 = vpop.permute.xlu0 %1500 }
 0xb7c   :  { %v1516_v18 = vmul.f32 %v1501_v17, %v2765_v27  ;;  %1532 = vrot.lane.b32.xlu1 %v1517_v15, %s2161_s30 }
 0xb7e   :  { %1530 = vrot.lane.b32.xlu0 %v1516_v18, %s2161_s30 }
 0xbe6   :  { %v1507_v22 = vpop.permute.xlu1 %1506 }
 0xbe7   :  { %v1519_v28 = vmul.f32 %v1507_v22, %v2778_v8 }
 0xbe8   :  { %v1505_v46 = vpop.permute.xlu0 %1504 }
 0xbe9   :  { %v1518_v29 = vmul.f32 %v1505_v46, %v2784_v10  ;;  %1536 = vrot.lane.b32.xlu1 %v1519_v28, %s2161_s30 }
 0xbea   :  { %v1529_v31 = vpop.permute.xlu1 %1528 }
 0xbeb   :  { %v1545_v43 = vadd.f32 %v1529_v31, %v1485_v39  ;;  %1534 = vrot.lane.b32.xlu0 %v1518_v29, %s2161_s30 }
 0xbec   :  { %v1527_v23 = vpop.permute.xlu0 %1526 }
 0xbed   :  { %2027 = vtanh.f32 %v1545_v43  ;;  %v1544_v35 = vadd.f32 %v1527_v23, %v1484_v33 }
 0xbee   :  { %v1533_v20 = vpop.permute.xlu1 %1532 }
 0xbef   :  { %2029 = vtanh.f32 %v1544_v35  ;;  %v1547_v63 = vadd.f32 %v1533_v20, %v1487_v12 }
 0xbf0   :  { %v1531_v34 = vpop.permute.xlu0 %1530 }
 0xbf1   :  { %2031 = vtanh.f32 %v1547_v63  ;;  %v1546_v26 = vadd.f32 %v1531_v34, %v1486_v44 }
 0xbf3   :  { %2033 = vtanh.f32 %v1546_v26 }
 0xbfa   :  { %v2028_v45 = vpop.eup %2027 }
 0xbfb   :  { %1564 = vrot.lane.b32.xlu1 %v2028_v45, %s2162_s9 }
 0xbfc   :  { %v2030_v37 = vpop.eup %2029 }
 0xbfd   :  { %1562 = vrot.lane.b32.xlu0 %v2030_v37, %s2162_s9 }
 0xbfe   :  { %v2032_v36 = vpop.eup %2031 }
 0xbff   :  { %1568 = vrot.lane.b32.xlu1 %v2032_v36, %s2162_s9 }
 0xc00   :  { %v2034_v16 = vpop.eup %2033 }
 0xc01   :  { %1566 = vrot.lane.b32.xlu0 %v2034_v16, %s2162_s9 }
 0xc5b   :  { %v1537_v24 = vpop.permute.xlu1 %1536 }
 0xc5c   :  { %v1549_v9 = vadd.f32 %v1537_v24, %v1489_v50 }
 0xc5d   :  { %v1535_v40 = vpop.permute.xlu0 %1534 }
 0xc5e   :  { %2035 = vtanh.f32 %v1549_v9  ;;  %v1548_v19 = vadd.f32 %v1535_v40, %v1488_v61 }
 0xc60   :  { %2037 = vtanh.f32 %v1548_v19 }
 0xc6b   :  { %v2036_v55 = vpop.eup %2035 }
 0xc6c   :  { %1572 = vrot.lane.b32.xlu1 %v2036_v55, %s2162_s9 }
 0xc6d   :  { %v2038_v30 = vpop.eup %2037  ;;  %v1565_v38 = vpop.permute.xlu1 %1564 }
 0xc6e   :  { %v1581_v32 = vmul.f32 %v1565_v38, %v2747_v25  ;;  %1570 = vrot.lane.b32.xlu0 %v2038_v30, %s2162_s9 }
 0xc6f   :  { %v1563_v58 = vpop.permute.xlu0 %1562 }
 0xc70   :  { %v1580_v41 = vmul.f32 %v1563_v58, %v2753_v21  ;;  %1594 = vrot.lane.b32.xlu1 %v1581_v32, %s2163_s10 }
 0xc71   :  { %v1569_v6 = vpop.permute.xlu1 %1568 }
 0xc72   :  { %v1583_v53 = vmul.f32 %v1569_v6, %v2759_v51  ;;  %1592 = vrot.lane.b32.xlu0 %v1580_v41, %s2163_s10 }
 0xc73   :  { %v1567_v54 = vpop.permute.xlu0 %1566 }
 0xc74   :  { %1598 = vrot.lane.b32.xlu1 %v1583_v53, %s2163_s10  ;;  %v1582_v25 = vmul.f32 %v1567_v54, %v2765_v27 }
 0xc76   :  { %1622 = vrot.lane.b32.xlu0 %v1544_v35, %s2167_s6 }
 0xc78   :  { %1624 = vrot.lane.b32.xlu1 %v1545_v43, %s2167_s6 }
 0xc7a   :  { %1626 = vrot.lane.b32.xlu0 %v1546_v26, %s2167_s6 }
 0xc7c   :  { %1628 = vrot.lane.b32.xlu1 %v1547_v63, %s2167_s6 }
 0xc7e   :  { %1596 = vrot.lane.b32.xlu0 %v1582_v25, %s2163_s10 }
 0xcde   :  { %v1573_v21 = vpop.permute.xlu1 %1572 }
 0xcdf   :  { %v1585_v59 = vmul.f32 %v1573_v21, %v2778_v8 }
 0xce0   :  { %v1571_v62 = vpop.permute.xlu0 %1570 }
 0xce1   :  { %v1584_v51 = vmul.f32 %v1571_v62, %v2784_v10  ;;  %1602 = vrot.lane.b32.xlu1 %v1585_v59, %s2163_s10 }
 0xce2   :  { %v1595_v7 = vpop.permute.xlu1 %1594 }
 0xce3   :  { %1611 = vst.msk [vmem:[%s2886_s8 + $0x8] sm:$0xff] %vm470_vm7, %v1595_v7  ;;  %1600 = vrot.lane.b32.xlu0 %v1584_v51, %s2163_s10 }
 0xce4   :  { %v1593_v27 = vpop.permute.xlu0 %1592 }
 0xce5   :  { %1610 = vst.msk [vmem:[%s2886_s8] sm:$0xff] %vm470_vm7, %v1593_v27  ;;  %1632 = vrot.lane.b32.xlu1 %v1549_v9, %s2167_s6 }
 0xce6   :  { %v1599_v60 = vpop.permute.xlu1 %1598 }
 0xce7   :  { %1613 = vst.msk [vmem:[%s2886_s8 + $0x18] sm:$0xff] %vm470_vm7, %v1599_v60  ;;  %1630 = vrot.lane.b32.xlu0 %v1548_v19, %s2167_s6 }
 0xce8   :  { %v1623_v1 = vpop.permute.xlu0 %1622 }
 0xce9   :  { %1703 = vst.msk [vmem:[%s2886_s8 + $0x30] sm:$0xff] %vm470_vm7, %v1623_v1 }
 0xcea   :  { %v1625_v3 = vpop.permute.xlu1 %1624 }
 0xceb   :  { %1704 = vst.msk [vmem:[%s2886_s8 + $0x38] sm:$0xff] %vm470_vm7, %v1625_v3 }
 0xcec   :  { %v1627_v2 = vpop.permute.xlu0 %1626 }
 0xced   :  { %1705 = vst.msk [vmem:[%s2886_s8 + $0x40] sm:$0xff] %vm470_vm7, %v1627_v2 }
 0xcee   :  { %v1629_v57 = vpop.permute.xlu1 %1628 }
 0xcef   :  { %1706 = vst.msk [vmem:[%s2886_s8 + $0x48] sm:$0xff] %vm470_vm7, %v1629_v57 }
 0xcf0   :  { %v1597_v56 = vpop.permute.xlu0 %1596 }
 0xcf1   :  { %1612 = vst.msk [vmem:[%s2886_s8 + $0x10] sm:$0xff] %vm470_vm7, %v1597_v56 }
 0xd53   :  { %v1603_v48 = vpop.permute.xlu1 %1602 }
 0xd54   :  { %1615 = vst.msk [vmem:[%s2886_s8 + $0x28] sm:$0xff] %vm470_vm7, %v1603_v48 }
 0xd55   :  { %v1601_v49 = vpop.permute.xlu0 %1600 }
 0xd56   :  { %1614 = vst.msk [vmem:[%s2886_s8 + $0x20] sm:$0xff] %vm470_vm7, %v1601_v49 }
 0xd57   :  { %v1633_v42 = vpop.permute.xlu1 %1632 }
 0xd58   :  { %1708 = vst.msk [vmem:[%s2886_s8 + $0x58] sm:$0xff] %vm470_vm7, %v1633_v42 }
 0xd59   :  { %v1631_v4 = vpop.permute.xlu0 %1630 }
 0xd5a   :  { %1707 = vst.msk [vmem:[%s2886_s8 + $0x50] sm:$0xff] %vm470_vm7, %v1631_v4 }
 0xd5b   :  { %1655 = vsyncpa [#allocation4], 1 }
 0xd5c   :  { %1656 = vsyncpa [#allocation6], 1 }
 0xd5d   :  { %1657 = vsyncpa [#allocation9], 1 }

</bundles_post_ra>
